<compile_context>
chip_gen: v6e
topology: v6e:2x2x1
jax: 0.10.0
libtpu: 0.0.40
codegen_flags: <defaults>
</compile_context>

<pallas_src>
import jax
import jax.numpy as jnp
import numpy as np
from jax.experimental import pallas as pl
from jax.experimental.pallas import tpu as pltpu


def _sigmoid(x):
    return 1.0 / (1.0 + jnp.exp(-x))


# ------------------------------ fused kernel -------------------------------

def _alexnet_kernel(x_ref, c1w_ref, b1_ref, poolL_ref, poolR_ref,
                    c2w_ref, b2_ref, w3f_ref, b3_ref,
                    w4t_ref, b4_ref, w5t_ref, b5_ref, o_ref):
    f32 = jnp.float32
    x = x_ref[0]                                                  # (28, 28)

    # conv1: 5 banded matmuls on row-shifted slabs, channels stacked on lanes.
    #   H1[a, c*24 + b] = sum_di (x[di:di+24,:] @ B1[di])[a, c*24+b]
    acc1 = jnp.dot(x[0:24, :], c1w_ref[0], preferred_element_type=f32)
    for di in range(1, 5):
        acc1 = acc1 + jnp.dot(x[di:di + 24, :], c1w_ref[di],
                              preferred_element_type=f32)
    h1 = _sigmoid(acc1 + b1_ref[...])                             # (24, 144)

    # avgpool1 2x2: rows via (12,24) averaging matrix, cols via block-diag.
    p1 = jnp.dot(poolL_ref[...], h1, preferred_element_type=f32)  # (12, 144)
    p1 = jnp.dot(p1, poolR_ref[...], preferred_element_type=f32)  # (12, 72)

    # conv2: 5 banded matmuls, output channels stacked on lanes -> (8, 128)
    acc2 = jnp.dot(p1[0:8, :], c2w_ref[0], preferred_element_type=f32)
    for di in range(1, 5):
        acc2 = acc2 + jnp.dot(p1[di:di + 8, :], c2w_ref[di],
                              preferred_element_type=f32)
    h2 = _sigmoid(acc2 + b2_ref[...])                             # (8, 128)

    # avgpool2 + flatten are folded into the FC1 weights (w3fold).
    acc3 = b3_ref[...]                                            # (1, 120)
    for a in range(8):
        acc3 = acc3 + jnp.dot(h2[a:a + 1, :], w3f_ref[a],
                              preferred_element_type=f32)
    a3 = _sigmoid(acc3)                                           # (1, 120)
    a4 = _sigmoid(jnp.dot(a3, w4t_ref[...], preferred_element_type=f32)
                  + b4_ref[...])                                  # (1, 84)
    o_ref[0] = (jnp.dot(a4, w5t_ref[...], preferred_element_type=f32)
                + b5_ref[...])                                    # (1, 10)


# --------------------------- wrapper / weight prep --------------------------

def _prepare_operands(params):
    f32 = jnp.float32
    hp = jax.lax.Precision.HIGHEST
    w1 = params["w1"].astype(f32)   # (6, 1, 5, 5)
    b1 = params["b1"].astype(f32)
    w2 = params["w2"].astype(f32)   # (16, 6, 5, 5)
    b2 = params["b2"].astype(f32)
    w3 = params["w3"].astype(f32)   # (120, 256)  PyTorch (out, in)
    b3 = params["b3"].astype(f32)
    w4 = params["w4"].astype(f32)   # (84, 120)
    b4 = params["b4"].astype(f32)
    w5 = params["w5"].astype(f32)   # (10, 84)
    b5 = params["b5"].astype(f32)

    # Shift selectors: S1[dj, b+dj, b] = 1  (28 rows -> 24 outputs)
    dj = jnp.arange(5)
    S1 = (jnp.arange(28)[None, :, None]
          == jnp.arange(24)[None, None, :] + dj[:, None, None]).astype(f32)
    S2 = (jnp.arange(12)[None, :, None]
          == jnp.arange(8)[None, None, :] + dj[:, None, None]).astype(f32)

    # conv1 banded weights: B1[di, b+dj, c*24+b] = w1[c,0,di,dj]   -> (5,28,144)
    conv1w = jnp.einsum("jRb,cij->iRcb", S1, w1[:, 0], precision=hp
                        ).reshape(5, 28, 144)
    b1row = jnp.repeat(b1, 24).reshape(1, 144)

    # conv2 banded weights: B2[di, ci*12+b+dj, co*8+b] = w2[co,ci,di,dj]
    conv2w = jnp.einsum("jRb,ocij->icRob", S2, w2, precision=hp
                        ).reshape(5, 72, 128)
    b2row = jnp.repeat(b2, 8).reshape(1, 128)

    # 2x2 average pooling matrices (0.5 * 0.5 == 0.25 per output element).
    poolL = 0.5 * jnp.repeat(jnp.eye(12, dtype=f32), 2, axis=1)   # (12, 24)
    poolR = jnp.kron(jnp.eye(6, dtype=f32), poolL.T)              # (144, 72)

    # Fold pool2 + flatten into FC1:
    #   fc1[n] = b3[n] + sum_{co,a,b} h2[a, co*8+b]*0.25*w3[n, co*16+(a//2)*4+(b//2)]
    co = jnp.arange(16)[:, None, None]
    a = jnp.arange(8)[None, :, None]
    b = jnp.arange(8)[None, None, :]
    idx = co * 16 + (a // 2) * 4 + (b // 2)                       # (16, 8, 8)
    w3g = 0.25 * w3[:, idx]                                       # (120,16,8,8)
    w3fold = jnp.transpose(w3g, (2, 1, 3, 0)).reshape(8, 128, 120)

    return (conv1w, b1row, poolL, poolR, conv2w, b2row, w3fold,
            b3.reshape(1, 120), w4.T, b4.reshape(1, 84),
            w5.T, b5.reshape(1, 10))


@jax.jit
def alexnet_forward(x, params):
    B = x.shape[0]
    assert x.shape[1:] == (1, 28, 28), x.shape
    (conv1w, b1row, poolL, poolR, conv2w, b2row, w3fold,
     b3r, w4t, b4r, w5t, b5r) = _prepare_operands(params)
    x3 = x.reshape(B, 28, 28).astype(jnp.float32)

    def full(shape):
        nd = len(shape)
        return pl.BlockSpec(shape, lambda *_: (0,) * nd)

    in_specs = [
        pl.BlockSpec((1, 28, 28), lambda i: (i, 0, 0)),   # per-sample input
        full((5, 28, 144)), full((1, 144)),               # conv1 (banded)
        full((12, 24)), full((144, 72)),                  # pool1 matrices
        full((5, 72, 128)), full((1, 128)),               # conv2 (banded)
        full((8, 128, 120)), full((1, 120)),              # fc1 (pool2 folded in)
        full((120, 84)), full((1, 84)),                   # fc2
        full((84, 10)), full((1, 10)),                    # fc3
    ]

    out = pl.pallas_call(
        _alexnet_kernel,
        out_shape=jax.ShapeDtypeStruct((B, 1, 10), jnp.float32),
        grid=(B,),
        in_specs=in_specs,
        out_specs=pl.BlockSpec((1, 1, 10), lambda i: (i, 0, 0)),
        compiler_params=pltpu.CompilerParams(
            dimension_semantics=("parallel",),
            vmem_limit_bytes=32 * 1024 * 1024,
        ),
    )(x3, conv1w, b1row, poolL, poolR, conv2w, b2row, w3fold,
      b3r, w4t, b4r, w5t, b5r)
    return out.reshape(B, 10)


# --------------------------- pure-JAX reference -----------------------------

def reference_forward(x, params):
    hp = jax.lax.Precision.HIGHEST

    def conv(x, w, b):
        y = jax.lax.conv_general_dilated(
            x, w, (1, 1), "VALID",
            dimension_numbers=("NCHW", "OIHW", "NCHW"), precision=hp)
        return jax.nn.sigmoid(y + b[None, :, None, None])

    def pool(x):
        s = jax.lax.reduce_window(x, 0.0, jax.lax.add,
                                  (1, 1, 2, 2), (1, 1, 2, 2), "VALID")
        return s * 0.25

    h = pool(conv(x, params["w1"], params["b1"]))
    h = pool(conv(h, params["w2"], params["b2"]))
    h = h.reshape(h.shape[0], -1)
    h = jax.nn.sigmoid(jnp.dot(h, params["w3"].T, precision=hp) + params["b3"])
    h = jax.nn.sigmoid(jnp.dot(h, params["w4"].T, precision=hp) + params["b4"])
    return jnp.dot(h, params["w5"].T, precision=hp) + params["b5"]


# ---------------------------------- main ------------------------------------

def init_params(key):
    ks = jax.random.split(key, 10)
    f32 = jnp.float32
    return {
        "w1": 0.1 * jax.random.normal(ks[0], (6, 1, 5, 5), f32),
        "b1": 0.1 * jax.random.normal(ks[1], (6,), f32),
        "w2": 0.1 * jax.random.normal(ks[2], (16, 6, 5, 5), f32),
        "b2": 0.1 * jax.random.normal(ks[3], (16,), f32),
        "w3": 0.1 * jax.random.normal(ks[4], (120, 256), f32),
        "b3": 0.1 * jax.random.normal(ks[5], (120,), f32),
        "w4": 0.1 * jax.random.normal(ks[6], (84, 120), f32),
        "b4": 0.1 * jax.random.normal(ks[7], (84,), f32),
        "w5": 0.1 * jax.random.normal(ks[8], (10, 84), f32),
        "b5": 0.1 * jax.random.normal(ks[9], (10,), f32),
    }


if __name__ == "__main__":
    key = jax.random.PRNGKey(0)
    pkey, xkey = jax.random.split(key)
    params = init_params(pkey)

    # 28x28 input is implied by the 16*4*4 flatten size (28->24->12->8->4).
    x = jax.random.normal(xkey, (2, 1, 28, 28), jnp.float32)

    out = jax.block_until_ready(alexnet_forward(x, params))
    assert out.shape == (2, 10), out.shape

    ref = jax.block_until_ready(reference_forward(x, params))
    np.testing.assert_allclose(np.asarray(out), np.asarray(ref),
                               rtol=2e-3, atol=2e-3)

    print("KERNEL_OK")
</pallas_src>

<mosaic_0001>
module attributes {stable_mosaic.version = 11 : i64} {
  func.func @_alexnet_kernel(%arg0: i32, %arg1: memref<1x28x28xf32, #tpu.memory_space<vmem>>, %arg2: memref<5x28x144xf32, #tpu.memory_space<vmem>>, %arg3: memref<1x144xf32, #tpu.memory_space<vmem>>, %arg4: memref<12x24xf32, #tpu.memory_space<vmem>>, %arg5: memref<144x72xf32, #tpu.memory_space<vmem>>, %arg6: memref<5x72x128xf32, #tpu.memory_space<vmem>>, %arg7: memref<1x128xf32, #tpu.memory_space<vmem>>, %arg8: memref<8x128x120xf32, #tpu.memory_space<vmem>>, %arg9: memref<1x120xf32, #tpu.memory_space<vmem>>, %arg10: memref<120x84xf32, #tpu.memory_space<vmem>>, %arg11: memref<1x84xf32, #tpu.memory_space<vmem>>, %arg12: memref<84x10xf32, #tpu.memory_space<vmem>>, %arg13: memref<1x10xf32, #tpu.memory_space<vmem>>, %arg14: memref<1x1x10xf32, #tpu.memory_space<vmem>>) attributes {dimension_semantics = [#tpu.dimension_semantics<parallel>], iteration_bounds = array<i64: 2>, scalar_prefetch = 0 : i64, scratch_operands = 0 : i64, tpu.core_type = #tpu.core_type<tc>, window_params = [{transform_indices = @transform_0, window_bounds = array<i64: 1, 28, 28>}, {pipeline_mode = #tpu.pipeline_mode<synchronous>, transform_indices = @transform_1, window_bounds = array<i64: 5, 28, 144>}, {pipeline_mode = #tpu.pipeline_mode<synchronous>, transform_indices = @transform_2, window_bounds = array<i64: 1, 144>}, {pipeline_mode = #tpu.pipeline_mode<synchronous>, transform_indices = @transform_3, window_bounds = array<i64: 12, 24>}, {pipeline_mode = #tpu.pipeline_mode<synchronous>, transform_indices = @transform_4, window_bounds = array<i64: 144, 72>}, {pipeline_mode = #tpu.pipeline_mode<synchronous>, transform_indices = @transform_5, window_bounds = array<i64: 5, 72, 128>}, {pipeline_mode = #tpu.pipeline_mode<synchronous>, transform_indices = @transform_6, window_bounds = array<i64: 1, 128>}, {pipeline_mode = #tpu.pipeline_mode<synchronous>, transform_indices = @transform_7, window_bounds = array<i64: 8, 128, 120>}, {pipeline_mode = #tpu.pipeline_mode<synchronous>, transform_indices = @transform_8, window_bounds = array<i64: 1, 120>}, {pipeline_mode = #tpu.pipeline_mode<synchronous>, transform_indices = @transform_9, window_bounds = array<i64: 120, 84>}, {pipeline_mode = #tpu.pipeline_mode<synchronous>, transform_indices = @transform_10, window_bounds = array<i64: 1, 84>}, {pipeline_mode = #tpu.pipeline_mode<synchronous>, transform_indices = @transform_11, window_bounds = array<i64: 84, 10>}, {pipeline_mode = #tpu.pipeline_mode<synchronous>, transform_indices = @transform_12, window_bounds = array<i64: 1, 10>}, {transform_indices = @transform_13, window_bounds = array<i64: 1, 1, 10>}]} {
    %c0 = arith.constant 0 : index
    %c0_0 = arith.constant 0 : index
    %c0_1 = arith.constant 0 : index
    %0 = vector.load %arg1[%c0, %c0_0, %c0_1] : memref<1x28x28xf32, #tpu.memory_space<vmem>>, vector<1x28x28xf32>
    %1 = vector.shape_cast %0 : vector<1x28x28xf32> to vector<28x28xf32>
    %2 = vector.extract_strided_slice %1 {offsets = [0, 0], sizes = [24, 28], strides = [1, 1]} : vector<28x28xf32> to vector<24x28xf32>
    %c0_2 = arith.constant 0 : index
    %c0_3 = arith.constant 0 : index
    %c0_4 = arith.constant 0 : index
    %3 = vector.load %arg2[%c0_2, %c0_3, %c0_4] : memref<5x28x144xf32, #tpu.memory_space<vmem>>, vector<1x28x144xf32>
    %4 = vector.shape_cast %3 : vector<1x28x144xf32> to vector<28x144xf32>
    %cst = arith.constant dense<0.000000e+00> : vector<24x144xf32>
    %5 = tpu.matmul %2, %4, %cst {dimension_numbers = #tpu.dot_dimension_numbers<[1], [0], [0], [1], [0, 0, 1, 1], [], []>} : vector<24x28xf32>, vector<28x144xf32>, vector<24x144xf32> -> vector<24x144xf32>
    %6 = vector.extract_strided_slice %1 {offsets = [1, 0], sizes = [24, 28], strides = [1, 1]} : vector<28x28xf32> to vector<24x28xf32>
    %c1 = arith.constant 1 : index
    %c0_5 = arith.constant 0 : index
    %c0_6 = arith.constant 0 : index
    %7 = vector.load %arg2[%c1, %c0_5, %c0_6] : memref<5x28x144xf32, #tpu.memory_space<vmem>>, vector<1x28x144xf32>
    %8 = vector.shape_cast %7 : vector<1x28x144xf32> to vector<28x144xf32>
    %cst_7 = arith.constant dense<0.000000e+00> : vector<24x144xf32>
    %9 = tpu.matmul %6, %8, %cst_7 {dimension_numbers = #tpu.dot_dimension_numbers<[1], [0], [0], [1], [0, 0, 1, 1], [], []>} : vector<24x28xf32>, vector<28x144xf32>, vector<24x144xf32> -> vector<24x144xf32>
    %10 = arith.addf %5, %9 : vector<24x144xf32>
    %11 = vector.extract_strided_slice %1 {offsets = [2, 0], sizes = [24, 28], strides = [1, 1]} : vector<28x28xf32> to vector<24x28xf32>
    %c2 = arith.constant 2 : index
    %c0_8 = arith.constant 0 : index
    %c0_9 = arith.constant 0 : index
    %12 = vector.load %arg2[%c2, %c0_8, %c0_9] : memref<5x28x144xf32, #tpu.memory_space<vmem>>, vector<1x28x144xf32>
    %13 = vector.shape_cast %12 : vector<1x28x144xf32> to vector<28x144xf32>
    %cst_10 = arith.constant dense<0.000000e+00> : vector<24x144xf32>
    %14 = tpu.matmul %11, %13, %cst_10 {dimension_numbers = #tpu.dot_dimension_numbers<[1], [0], [0], [1], [0, 0, 1, 1], [], []>} : vector<24x28xf32>, vector<28x144xf32>, vector<24x144xf32> -> vector<24x144xf32>
    %15 = arith.addf %10, %14 : vector<24x144xf32>
    %16 = vector.extract_strided_slice %1 {offsets = [3, 0], sizes = [24, 28], strides = [1, 1]} : vector<28x28xf32> to vector<24x28xf32>
    %c3 = arith.constant 3 : index
    %c0_11 = arith.constant 0 : index
    %c0_12 = arith.constant 0 : index
    %17 = vector.load %arg2[%c3, %c0_11, %c0_12] : memref<5x28x144xf32, #tpu.memory_space<vmem>>, vector<1x28x144xf32>
    %18 = vector.shape_cast %17 : vector<1x28x144xf32> to vector<28x144xf32>
    %cst_13 = arith.constant dense<0.000000e+00> : vector<24x144xf32>
    %19 = tpu.matmul %16, %18, %cst_13 {dimension_numbers = #tpu.dot_dimension_numbers<[1], [0], [0], [1], [0, 0, 1, 1], [], []>} : vector<24x28xf32>, vector<28x144xf32>, vector<24x144xf32> -> vector<24x144xf32>
    %20 = arith.addf %15, %19 : vector<24x144xf32>
    %21 = vector.extract_strided_slice %1 {offsets = [4, 0], sizes = [24, 28], strides = [1, 1]} : vector<28x28xf32> to vector<24x28xf32>
    %c4 = arith.constant 4 : index
    %c0_14 = arith.constant 0 : index
    %c0_15 = arith.constant 0 : index
    %22 = vector.load %arg2[%c4, %c0_14, %c0_15] : memref<5x28x144xf32, #tpu.memory_space<vmem>>, vector<1x28x144xf32>
    %23 = vector.shape_cast %22 : vector<1x28x144xf32> to vector<28x144xf32>
    %cst_16 = arith.constant dense<0.000000e+00> : vector<24x144xf32>
    %24 = tpu.matmul %21, %23, %cst_16 {dimension_numbers = #tpu.dot_dimension_numbers<[1], [0], [0], [1], [0, 0, 1, 1], [], []>} : vector<24x28xf32>, vector<28x144xf32>, vector<24x144xf32> -> vector<24x144xf32>
    %25 = arith.addf %20, %24 : vector<24x144xf32>
    %c0_17 = arith.constant 0 : index
    %c0_18 = arith.constant 0 : index
    %26 = vector.load %arg3[%c0_17, %c0_18] : memref<1x144xf32, #tpu.memory_space<vmem>>, vector<1x144xf32>
    %27 = vector.broadcast %26 : vector<1x144xf32> to vector<24x144xf32>
    %28 = arith.addf %25, %27 : vector<24x144xf32>
    %cst_19 = arith.constant 0.000000e+00 : f32
    %29 = vector.broadcast %cst_19 : f32 to vector<24x144xf32>
    %30 = arith.subf %29, %28 : vector<24x144xf32>
    %31 = math.exp %30 : vector<24x144xf32>
    %cst_20 = arith.constant 1.000000e+00 : f32
    %32 = vector.broadcast %cst_20 : f32 to vector<24x144xf32>
    %33 = arith.addf %32, %31 : vector<24x144xf32>
    %cst_21 = arith.constant 1.000000e+00 : f32
    %34 = vector.broadcast %cst_21 : f32 to vector<24x144xf32>
    %35 = arith.divf %34, %33 : vector<24x144xf32>
    %c0_22 = arith.constant 0 : index
    %c0_23 = arith.constant 0 : index
    %36 = vector.load %arg4[%c0_22, %c0_23] : memref<12x24xf32, #tpu.memory_space<vmem>>, vector<12x24xf32>
    %cst_24 = arith.constant dense<0.000000e+00> : vector<12x144xf32>
    %37 = tpu.matmul %36, %35, %cst_24 {dimension_numbers = #tpu.dot_dimension_numbers<[1], [0], [0], [1], [0, 0, 1, 1], [], []>} : vector<12x24xf32>, vector<24x144xf32>, vector<12x144xf32> -> vector<12x144xf32>
    %c0_25 = arith.constant 0 : index
    %c0_26 = arith.constant 0 : index
    %38 = vector.load %arg5[%c0_25, %c0_26] : memref<144x72xf32, #tpu.memory_space<vmem>>, vector<144x72xf32>
    %cst_27 = arith.constant dense<0.000000e+00> : vector<12x72xf32>
    %39 = tpu.matmul %37, %38, %cst_27 {dimension_numbers = #tpu.dot_dimension_numbers<[1], [0], [0], [1], [0, 0, 1, 1], [], []>} : vector<12x144xf32>, vector<144x72xf32>, vector<12x72xf32> -> vector<12x72xf32>
    %40 = vector.extract_strided_slice %39 {offsets = [0, 0], sizes = [8, 72], strides = [1, 1]} : vector<12x72xf32> to vector<8x72xf32>
    %c0_28 = arith.constant 0 : index
    %c0_29 = arith.constant 0 : index
    %c0_30 = arith.constant 0 : index
    %41 = vector.load %arg6[%c0_28, %c0_29, %c0_30] : memref<5x72x128xf32, #tpu.memory_space<vmem>>, vector<1x72x128xf32>
    %42 = vector.shape_cast %41 : vector<1x72x128xf32> to vector<72x128xf32>
    %cst_31 = arith.constant dense<0.000000e+00> : vector<8x128xf32>
    %43 = tpu.matmul %40, %42, %cst_31 {dimension_numbers = #tpu.dot_dimension_numbers<[1], [0], [0], [1], [0, 0, 1, 1], [], []>} : vector<8x72xf32>, vector<72x128xf32>, vector<8x128xf32> -> vector<8x128xf32>
    %44 = vector.extract_strided_slice %39 {offsets = [1, 0], sizes = [8, 72], strides = [1, 1]} : vector<12x72xf32> to vector<8x72xf32>
    %c1_32 = arith.constant 1 : index
    %c0_33 = arith.constant 0 : index
    %c0_34 = arith.constant 0 : index
    %45 = vector.load %arg6[%c1_32, %c0_33, %c0_34] : memref<5x72x128xf32, #tpu.memory_space<vmem>>, vector<1x72x128xf32>
    %46 = vector.shape_cast %45 : vector<1x72x128xf32> to vector<72x128xf32>
    %cst_35 = arith.constant dense<0.000000e+00> : vector<8x128xf32>
    %47 = tpu.matmul %44, %46, %cst_35 {dimension_numbers = #tpu.dot_dimension_numbers<[1], [0], [0], [1], [0, 0, 1, 1], [], []>} : vector<8x72xf32>, vector<72x128xf32>, vector<8x128xf32> -> vector<8x128xf32>
    %48 = arith.addf %43, %47 : vector<8x128xf32>
    %49 = vector.extract_strided_slice %39 {offsets = [2, 0], sizes = [8, 72], strides = [1, 1]} : vector<12x72xf32> to vector<8x72xf32>
    %c2_36 = arith.constant 2 : index
    %c0_37 = arith.constant 0 : index
    %c0_38 = arith.constant 0 : index
    %50 = vector.load %arg6[%c2_36, %c0_37, %c0_38] : memref<5x72x128xf32, #tpu.memory_space<vmem>>, vector<1x72x128xf32>
    %51 = vector.shape_cast %50 : vector<1x72x128xf32> to vector<72x128xf32>
    %cst_39 = arith.constant dense<0.000000e+00> : vector<8x128xf32>
    %52 = tpu.matmul %49, %51, %cst_39 {dimension_numbers = #tpu.dot_dimension_numbers<[1], [0], [0], [1], [0, 0, 1, 1], [], []>} : vector<8x72xf32>, vector<72x128xf32>, vector<8x128xf32> -> vector<8x128xf32>
    %53 = arith.addf %48, %52 : vector<8x128xf32>
    %54 = vector.extract_strided_slice %39 {offsets = [3, 0], sizes = [8, 72], strides = [1, 1]} : vector<12x72xf32> to vector<8x72xf32>
    %c3_40 = arith.constant 3 : index
    %c0_41 = arith.constant 0 : index
    %c0_42 = arith.constant 0 : index
    %55 = vector.load %arg6[%c3_40, %c0_41, %c0_42] : memref<5x72x128xf32, #tpu.memory_space<vmem>>, vector<1x72x128xf32>
    %56 = vector.shape_cast %55 : vector<1x72x128xf32> to vector<72x128xf32>
    %cst_43 = arith.constant dense<0.000000e+00> : vector<8x128xf32>
    %57 = tpu.matmul %54, %56, %cst_43 {dimension_numbers = #tpu.dot_dimension_numbers<[1], [0], [0], [1], [0, 0, 1, 1], [], []>} : vector<8x72xf32>, vector<72x128xf32>, vector<8x128xf32> -> vector<8x128xf32>
    %58 = arith.addf %53, %57 : vector<8x128xf32>
    %59 = vector.extract_strided_slice %39 {offsets = [4, 0], sizes = [8, 72], strides = [1, 1]} : vector<12x72xf32> to vector<8x72xf32>
    %c4_44 = arith.constant 4 : index
    %c0_45 = arith.constant 0 : index
    %c0_46 = arith.constant 0 : index
    %60 = vector.load %arg6[%c4_44, %c0_45, %c0_46] : memref<5x72x128xf32, #tpu.memory_space<vmem>>, vector<1x72x128xf32>
    %61 = vector.shape_cast %60 : vector<1x72x128xf32> to vector<72x128xf32>
    %cst_47 = arith.constant dense<0.000000e+00> : vector<8x128xf32>
    %62 = tpu.matmul %59, %61, %cst_47 {dimension_numbers = #tpu.dot_dimension_numbers<[1], [0], [0], [1], [0, 0, 1, 1], [], []>} : vector<8x72xf32>, vector<72x128xf32>, vector<8x128xf32> -> vector<8x128xf32>
    %63 = arith.addf %58, %62 : vector<8x128xf32>
    %c0_48 = arith.constant 0 : index
    %c0_49 = arith.constant 0 : index
    %64 = vector.load %arg7[%c0_48, %c0_49] : memref<1x128xf32, #tpu.memory_space<vmem>>, vector<1x128xf32>
    %65 = vector.broadcast %64 : vector<1x128xf32> to vector<8x128xf32>
    %66 = arith.addf %63, %65 : vector<8x128xf32>
    %cst_50 = arith.constant 0.000000e+00 : f32
    %67 = vector.broadcast %cst_50 : f32 to vector<8x128xf32>
    %68 = arith.subf %67, %66 : vector<8x128xf32>
    %69 = math.exp %68 : vector<8x128xf32>
    %cst_51 = arith.constant 1.000000e+00 : f32
    %70 = vector.broadcast %cst_51 : f32 to vector<8x128xf32>
    %71 = arith.addf %70, %69 : vector<8x128xf32>
    %cst_52 = arith.constant 1.000000e+00 : f32
    %72 = vector.broadcast %cst_52 : f32 to vector<8x128xf32>
    %73 = arith.divf %72, %71 : vector<8x128xf32>
    %c0_53 = arith.constant 0 : index
    %c0_54 = arith.constant 0 : index
    %74 = vector.load %arg9[%c0_53, %c0_54] : memref<1x120xf32, #tpu.memory_space<vmem>>, vector<1x120xf32>
    %75 = vector.extract_strided_slice %73 {offsets = [0, 0], sizes = [1, 128], strides = [1, 1]} : vector<8x128xf32> to vector<1x128xf32>
    %c0_55 = arith.constant 0 : index
    %c0_56 = arith.constant 0 : index
    %c0_57 = arith.constant 0 : index
    %76 = vector.load %arg8[%c0_55, %c0_56, %c0_57] : memref<8x128x120xf32, #tpu.memory_space<vmem>>, vector<1x128x120xf32>
    %77 = vector.shape_cast %76 : vector<1x128x120xf32> to vector<128x120xf32>
    %cst_58 = arith.constant dense<0.000000e+00> : vector<1x120xf32>
    %78 = tpu.matmul %75, %77, %cst_58 {dimension_numbers = #tpu.dot_dimension_numbers<[1], [0], [0], [1], [0, 0, 1, 1], [], []>} : vector<1x128xf32>, vector<128x120xf32>, vector<1x120xf32> -> vector<1x120xf32>
    %79 = arith.addf %74, %78 : vector<1x120xf32>
    %80 = vector.extract_strided_slice %73 {offsets = [1, 0], sizes = [1, 128], strides = [1, 1]} : vector<8x128xf32> to vector<1x128xf32>
    %c1_59 = arith.constant 1 : index
    %c0_60 = arith.constant 0 : index
    %c0_61 = arith.constant 0 : index
    %81 = vector.load %arg8[%c1_59, %c0_60, %c0_61] : memref<8x128x120xf32, #tpu.memory_space<vmem>>, vector<1x128x120xf32>
    %82 = vector.shape_cast %81 : vector<1x128x120xf32> to vector<128x120xf32>
    %cst_62 = arith.constant dense<0.000000e+00> : vector<1x120xf32>
    %83 = tpu.matmul %80, %82, %cst_62 {dimension_numbers = #tpu.dot_dimension_numbers<[1], [0], [0], [1], [0, 0, 1, 1], [], []>} : vector<1x128xf32>, vector<128x120xf32>, vector<1x120xf32> -> vector<1x120xf32>
    %84 = arith.addf %79, %83 : vector<1x120xf32>
    %85 = vector.extract_strided_slice %73 {offsets = [2, 0], sizes = [1, 128], strides = [1, 1]} : vector<8x128xf32> to vector<1x128xf32>
    %c2_63 = arith.constant 2 : index
    %c0_64 = arith.constant 0 : index
    %c0_65 = arith.constant 0 : index
    %86 = vector.load %arg8[%c2_63, %c0_64, %c0_65] : memref<8x128x120xf32, #tpu.memory_space<vmem>>, vector<1x128x120xf32>
    %87 = vector.shape_cast %86 : vector<1x128x120xf32> to vector<128x120xf32>
    %cst_66 = arith.constant dense<0.000000e+00> : vector<1x120xf32>
    %88 = tpu.matmul %85, %87, %cst_66 {dimension_numbers = #tpu.dot_dimension_numbers<[1], [0], [0], [1], [0, 0, 1, 1], [], []>} : vector<1x128xf32>, vector<128x120xf32>, vector<1x120xf32> -> vector<1x120xf32>
    %89 = arith.addf %84, %88 : vector<1x120xf32>
    %90 = vector.extract_strided_slice %73 {offsets = [3, 0], sizes = [1, 128], strides = [1, 1]} : vector<8x128xf32> to vector<1x128xf32>
    %c3_67 = arith.constant 3 : index
    %c0_68 = arith.constant 0 : index
    %c0_69 = arith.constant 0 : index
    %91 = vector.load %arg8[%c3_67, %c0_68, %c0_69] : memref<8x128x120xf32, #tpu.memory_space<vmem>>, vector<1x128x120xf32>
    %92 = vector.shape_cast %91 : vector<1x128x120xf32> to vector<128x120xf32>
    %cst_70 = arith.constant dense<0.000000e+00> : vector<1x120xf32>
    %93 = tpu.matmul %90, %92, %cst_70 {dimension_numbers = #tpu.dot_dimension_numbers<[1], [0], [0], [1], [0, 0, 1, 1], [], []>} : vector<1x128xf32>, vector<128x120xf32>, vector<1x120xf32> -> vector<1x120xf32>
    %94 = arith.addf %89, %93 : vector<1x120xf32>
    %95 = vector.extract_strided_slice %73 {offsets = [4, 0], sizes = [1, 128], strides = [1, 1]} : vector<8x128xf32> to vector<1x128xf32>
    %c4_71 = arith.constant 4 : index
    %c0_72 = arith.constant 0 : index
    %c0_73 = arith.constant 0 : index
    %96 = vector.load %arg8[%c4_71, %c0_72, %c0_73] : memref<8x128x120xf32, #tpu.memory_space<vmem>>, vector<1x128x120xf32>
    %97 = vector.shape_cast %96 : vector<1x128x120xf32> to vector<128x120xf32>
    %cst_74 = arith.constant dense<0.000000e+00> : vector<1x120xf32>
    %98 = tpu.matmul %95, %97, %cst_74 {dimension_numbers = #tpu.dot_dimension_numbers<[1], [0], [0], [1], [0, 0, 1, 1], [], []>} : vector<1x128xf32>, vector<128x120xf32>, vector<1x120xf32> -> vector<1x120xf32>
    %99 = arith.addf %94, %98 : vector<1x120xf32>
    %100 = vector.extract_strided_slice %73 {offsets = [5, 0], sizes = [1, 128], strides = [1, 1]} : vector<8x128xf32> to vector<1x128xf32>
    %c5 = arith.constant 5 : index
    %c0_75 = arith.constant 0 : index
    %c0_76 = arith.constant 0 : index
    %101 = vector.load %arg8[%c5, %c0_75, %c0_76] : memref<8x128x120xf32, #tpu.memory_space<vmem>>, vector<1x128x120xf32>
    %102 = vector.shape_cast %101 : vector<1x128x120xf32> to vector<128x120xf32>
    %cst_77 = arith.constant dense<0.000000e+00> : vector<1x120xf32>
    %103 = tpu.matmul %100, %102, %cst_77 {dimension_numbers = #tpu.dot_dimension_numbers<[1], [0], [0], [1], [0, 0, 1, 1], [], []>} : vector<1x128xf32>, vector<128x120xf32>, vector<1x120xf32> -> vector<1x120xf32>
    %104 = arith.addf %99, %103 : vector<1x120xf32>
    %105 = vector.extract_strided_slice %73 {offsets = [6, 0], sizes = [1, 128], strides = [1, 1]} : vector<8x128xf32> to vector<1x128xf32>
    %c6 = arith.constant 6 : index
    %c0_78 = arith.constant 0 : index
    %c0_79 = arith.constant 0 : index
    %106 = vector.load %arg8[%c6, %c0_78, %c0_79] : memref<8x128x120xf32, #tpu.memory_space<vmem>>, vector<1x128x120xf32>
    %107 = vector.shape_cast %106 : vector<1x128x120xf32> to vector<128x120xf32>
    %cst_80 = arith.constant dense<0.000000e+00> : vector<1x120xf32>
    %108 = tpu.matmul %105, %107, %cst_80 {dimension_numbers = #tpu.dot_dimension_numbers<[1], [0], [0], [1], [0, 0, 1, 1], [], []>} : vector<1x128xf32>, vector<128x120xf32>, vector<1x120xf32> -> vector<1x120xf32>
    %109 = arith.addf %104, %108 : vector<1x120xf32>
    %110 = vector.extract_strided_slice %73 {offsets = [7, 0], sizes = [1, 128], strides = [1, 1]} : vector<8x128xf32> to vector<1x128xf32>
    %c7 = arith.constant 7 : index
    %c0_81 = arith.constant 0 : index
    %c0_82 = arith.constant 0 : index
    %111 = vector.load %arg8[%c7, %c0_81, %c0_82] : memref<8x128x120xf32, #tpu.memory_space<vmem>>, vector<1x128x120xf32>
    %112 = vector.shape_cast %111 : vector<1x128x120xf32> to vector<128x120xf32>
    %cst_83 = arith.constant dense<0.000000e+00> : vector<1x120xf32>
    %113 = tpu.matmul %110, %112, %cst_83 {dimension_numbers = #tpu.dot_dimension_numbers<[1], [0], [0], [1], [0, 0, 1, 1], [], []>} : vector<1x128xf32>, vector<128x120xf32>, vector<1x120xf32> -> vector<1x120xf32>
    %114 = arith.addf %109, %113 : vector<1x120xf32>
    %cst_84 = arith.constant 0.000000e+00 : f32
    %115 = vector.broadcast %cst_84 : f32 to vector<1x120xf32>
    %116 = arith.subf %115, %114 : vector<1x120xf32>
    %117 = math.exp %116 : vector<1x120xf32>
    %cst_85 = arith.constant 1.000000e+00 : f32
    %118 = vector.broadcast %cst_85 : f32 to vector<1x120xf32>
    %119 = arith.addf %118, %117 : vector<1x120xf32>
    %cst_86 = arith.constant 1.000000e+00 : f32
    %120 = vector.broadcast %cst_86 : f32 to vector<1x120xf32>
    %121 = arith.divf %120, %119 : vector<1x120xf32>
    %c0_87 = arith.constant 0 : index
    %c0_88 = arith.constant 0 : index
    %122 = vector.load %arg10[%c0_87, %c0_88] : memref<120x84xf32, #tpu.memory_space<vmem>>, vector<120x84xf32>
    %cst_89 = arith.constant dense<0.000000e+00> : vector<1x84xf32>
    %123 = tpu.matmul %121, %122, %cst_89 {dimension_numbers = #tpu.dot_dimension_numbers<[1], [0], [0], [1], [0, 0, 1, 1], [], []>} : vector<1x120xf32>, vector<120x84xf32>, vector<1x84xf32> -> vector<1x84xf32>
    %c0_90 = arith.constant 0 : index
    %c0_91 = arith.constant 0 : index
    %124 = vector.load %arg11[%c0_90, %c0_91] : memref<1x84xf32, #tpu.memory_space<vmem>>, vector<1x84xf32>
    %125 = arith.addf %123, %124 : vector<1x84xf32>
    %cst_92 = arith.constant 0.000000e+00 : f32
    %126 = vector.broadcast %cst_92 : f32 to vector<1x84xf32>
    %127 = arith.subf %126, %125 : vector<1x84xf32>
    %128 = math.exp %127 : vector<1x84xf32>
    %cst_93 = arith.constant 1.000000e+00 : f32
    %129 = vector.broadcast %cst_93 : f32 to vector<1x84xf32>
    %130 = arith.addf %129, %128 : vector<1x84xf32>
    %cst_94 = arith.constant 1.000000e+00 : f32
    %131 = vector.broadcast %cst_94 : f32 to vector<1x84xf32>
    %132 = arith.divf %131, %130 : vector<1x84xf32>
    %c0_95 = arith.constant 0 : index
    %c0_96 = arith.constant 0 : index
    %133 = vector.load %arg12[%c0_95, %c0_96] : memref<84x10xf32, #tpu.memory_space<vmem>>, vector<84x10xf32>
    %cst_97 = arith.constant dense<0.000000e+00> : vector<1x10xf32>
    %134 = tpu.matmul %132, %133, %cst_97 {dimension_numbers = #tpu.dot_dimension_numbers<[1], [0], [0], [1], [0, 0, 1, 1], [], []>} : vector<1x84xf32>, vector<84x10xf32>, vector<1x10xf32> -> vector<1x10xf32>
    %c0_98 = arith.constant 0 : index
    %c0_99 = arith.constant 0 : index
    %135 = vector.load %arg13[%c0_98, %c0_99] : memref<1x10xf32, #tpu.memory_space<vmem>>, vector<1x10xf32>
    %136 = arith.addf %134, %135 : vector<1x10xf32>
    %c0_100 = arith.constant 0 : index
    %c0_101 = arith.constant 0 : index
    %c0_102 = arith.constant 0 : index
    %137 = vector.load %arg14[%c0_100, %c0_101, %c0_102] : memref<1x1x10xf32, #tpu.memory_space<vmem>>, vector<1x1x10xf32>
    %138 = vector.shape_cast %137 : vector<1x1x10xf32> to vector<1x10xf32>
    %139 = vector.shape_cast %136 : vector<1x10xf32> to vector<1x1x10xf32>
    tpu.vector_store %arg14[%c0_100, %c0_101, %c0_102], %139 {strides = array<i32>} : memref<1x1x10xf32, #tpu.memory_space<vmem>>, vector<1x1x10xf32>,
    return
  }
  func.func @transform_0(%arg0: i32) -> (i32, i32, i32) {
    %c0_i32 = arith.constant 0 : i32
    %c0_i32_0 = arith.constant 0 : i32
    %c0_i32_1 = arith.constant 0 : i32
    return %arg0, %c0_i32, %c0_i32_0 : i32, i32, i32
  }
  func.func @transform_1(%arg0: i32) -> (i32, i32, i32) {
    %c0_i32 = arith.constant 0 : i32
    %c0_i32_0 = arith.constant 0 : i32
    %c0_i32_1 = arith.constant 0 : i32
    %c0_i32_2 = arith.constant 0 : i32
    return %c0_i32, %c0_i32_0, %c0_i32_1 : i32, i32, i32
  }
  func.func @transform_2(%arg0: i32) -> (i32, i32) {
    %c0_i32 = arith.constant 0 : i32
    %c0_i32_0 = arith.constant 0 : i32
    %c0_i32_1 = arith.constant 0 : i32
    return %c0_i32, %c0_i32_0 : i32, i32
  }
  func.func @transform_3(%arg0: i32) -> (i32, i32) {
    %c0_i32 = arith.constant 0 : i32
    %c0_i32_0 = arith.constant 0 : i32
    %c0_i32_1 = arith.constant 0 : i32
    return %c0_i32, %c0_i32_0 : i32, i32
  }
  func.func @transform_4(%arg0: i32) -> (i32, i32) {
    %c0_i32 = arith.constant 0 : i32
    %c0_i32_0 = arith.constant 0 : i32
    %c0_i32_1 = arith.constant 0 : i32
    return %c0_i32, %c0_i32_0 : i32, i32
  }
  func.func @transform_5(%arg0: i32) -> (i32, i32, i32) {
    %c0_i32 = arith.constant 0 : i32
    %c0_i32_0 = arith.constant 0 : i32
    %c0_i32_1 = arith.constant 0 : i32
    %c0_i32_2 = arith.constant 0 : i32
    return %c0_i32, %c0_i32_0, %c0_i32_1 : i32, i32, i32
  }
  func.func @transform_6(%arg0: i32) -> (i32, i32) {
    %c0_i32 = arith.constant 0 : i32
    %c0_i32_0 = arith.constant 0 : i32
    %c0_i32_1 = arith.constant 0 : i32
    return %c0_i32, %c0_i32_0 : i32, i32
  }
  func.func @transform_7(%arg0: i32) -> (i32, i32, i32) {
    %c0_i32 = arith.constant 0 : i32
    %c0_i32_0 = arith.constant 0 : i32
    %c0_i32_1 = arith.constant 0 : i32
    %c0_i32_2 = arith.constant 0 : i32
    return %c0_i32, %c0_i32_0, %c0_i32_1 : i32, i32, i32
  }
  func.func @transform_8(%arg0: i32) -> (i32, i32) {
    %c0_i32 = arith.constant 0 : i32
    %c0_i32_0 = arith.constant 0 : i32
    %c0_i32_1 = arith.constant 0 : i32
    return %c0_i32, %c0_i32_0 : i32, i32
  }
  func.func @transform_9(%arg0: i32) -> (i32, i32) {
    %c0_i32 = arith.constant 0 : i32
    %c0_i32_0 = arith.constant 0 : i32
    %c0_i32_1 = arith.constant 0 : i32
    return %c0_i32, %c0_i32_0 : i32, i32
  }
  func.func @transform_10(%arg0: i32) -> (i32, i32) {
    %c0_i32 = arith.constant 0 : i32
    %c0_i32_0 = arith.constant 0 : i32
    %c0_i32_1 = arith.constant 0 : i32
    return %c0_i32, %c0_i32_0 : i32, i32
  }
  func.func @transform_11(%arg0: i32) -> (i32, i32) {
    %c0_i32 = arith.constant 0 : i32
    %c0_i32_0 = arith.constant 0 : i32
    %c0_i32_1 = arith.constant 0 : i32
    return %c0_i32, %c0_i32_0 : i32, i32
  }
  func.func @transform_12(%arg0: i32) -> (i32, i32) {
    %c0_i32 = arith.constant 0 : i32
    %c0_i32_0 = arith.constant 0 : i32
    %c0_i32_1 = arith.constant 0 : i32
    return %c0_i32, %c0_i32_0 : i32, i32
  }
  func.func @transform_13(%arg0: i32) -> (i32, i32, i32) {
    %c0_i32 = arith.constant 0 : i32
    %c0_i32_0 = arith.constant 0 : i32
    %c0_i32_1 = arith.constant 0 : i32
    return %arg0, %c0_i32, %c0_i32_0 : i32, i32, i32
  }
}

</mosaic_0001>

<bundles_post_ra>
// kernel: alexnet_forward.1
= control target key start
LH: loop header
LB: loop body
LE: loop exit
PB: predicated region body
PF: predicated region fallthrough
CT: control target
= control target key end

     0   :  { %18 = vsyncpa [#allocation3], 0  ;;  %s5030_s0 = inlined_call_operand.vmem [shape: f32[2,28,28], index: 0, kind: input, shape index: {}]   ;;  %s5031_s1 = inlined_call_operand.vmem [shape: f32[5,28,144], index: 1, kind: input, shape index: {}]   ;;  %s5032_s2 = inlined_call_operand.vmem [shape: f32[1,144], index: 2, kind: input, shape index: {}]   ;;  %s5033_s3 = inlined_call_operand.vmem [shape: f32[12,24], index: 3, kind: input, shape index: {}]   ;;  %s5034_s4 = inlined_call_operand.vmem [shape: f32[144,72], index: 4, kind: input, shape index: {}]   ;;  %s5035_s5 = inlined_call_operand.vmem [shape: f32[5,72,128], index: 5, kind: input, shape index: {}]   ;;  %s5036_s6 = inlined_call_operand.vmem [shape: f32[1,128], index: 6, kind: input, shape index: {}]   ;;  %s5037_s7 = inlined_call_operand.vmem [shape: f32[8,128,120], index: 7, kind: input, shape index: {}]   ;;  %s5038_s8 = inlined_call_operand.vmem [shape: f32[1,120], index: 8, kind: input, shape index: {}]   ;;  %s5039_s9 = inlined_call_operand.vmem [shape: f32[120,84], index: 9, kind: input, shape index: {}]   ;;  %s5040_s10 = inlined_call_operand.vmem [shape: f32[1,84], index: 10, kind: input, shape index: {}]   ;;  %s5041_s11 = inlined_call_operand.vmem [shape: f32[84,10], index: 11, kind: input, shape index: {}]   ;;  %s5042_s12 = inlined_call_operand.vmem [shape: f32[1,10], index: 12, kind: input, shape index: {}]   ;;  %s5043_s13 = inlined_call_operand.hbm [shape: f32[2,1,10], index: 13, kind: output, shape index: {}]  }
   0x1   :  { %20 = vsyncpa [#allocation3 + $0x1], 0  ;;  %s3782_s25 = smov 0   ;;  %s3784_s26 = smov 0  }
   0x2   :  { %s3786_s27 = smov 0   ;;  %s3788_s28 = smov 0  }
   0x3 LB: > { %5048 = sst [smem:[#allocation5_spill]] %s3703_s27  ;;  %s3803_s29 = sadd.s32 4294967295, %s3707_s28   ;;  %s3707_s28 = sphi %s3788_s28, %s5055_s28   ;;  %s3703_s27 = sphi %s3786_s27, %s5057_s27   ;;  %s3699_s26 = sphi %s3784_s26, %s5059_s26   ;;  %s3695_s25 = sphi %s3782_s25, %s5058_s25  }
   0x4   : > { %s2677_s30 = sadd.s32 4294967294, %s3707_s28   ;;  %s3807_s14 = sadd.s32 1, %s3707_s28  }
   0x5   : > { %5049 = sst [smem:[#allocation6_spill]] %s3807_s14  ;;  %s311_s15 = sadd.s32 1, %s3703_s27 }
   0x6   : > { %s308_s16 = ssub.s32 %s3707_s28, %s3807_s14  ;;  %p321_p0 = scmp.ne.s32.totalorder %s3703_s27, %s3699_s26 }
   0x7   : > { %p309_p1 = scmp.eq.s32.totalorder %s308_s16, 0  ;;  %p322_p2 = scmp.eq.s32.totalorder %s3803_s29, 1 }
   0x8   : > { %p327_p3 = scmp.ne.s32.totalorder %s3699_s26, %s3695_s25  ;;  %p328_p4 = scmp.eq.s32.totalorder %s2677_s30, 1 }
   0x9   : > { %s3818_s17 = scalar_select %p309_p1, %s3703_s27, %s311_s15  }
   0xa   : > { %p3820_p5 = por %p322_p2, %p321_p0  ;;  %p3824_p6 = por %p328_p4, %p327_p3 }
   0xb   : > { %5050 = sst [smem:[#allocation7_spill]] %s3818_s17  ;;  %p2680_p7 = scmp.ge.s32.totalorder %s3707_s28, 1 }
   0xc   : > { %s5052_s19 = scalar_select %p3824_p6, 1, 0 }
   0xd   : > { %p390_p8 = scmp.lt.s32.totalorder %s3707_s28, 3 }
   0xe   : > { %5053 = sst [smem:[#allocation8_spill]] %s5052_s19 }
   0xf   : > { %p391_p9 = pnand %p2680_p7, %p390_p8 }
  0x10   : > { %p433_p10 = scmp.lt.s32.totalorder (!%p391_p9), %s3803_s29, 1  ;;  %s431_s19 = sand.u32 (!%p391_p9), 1, %s3699_s26  }
  0x11   : > { %394 = sbr.rel (%p391_p9) target bundleno = 1739 (0x6cb), region = 72  ;;  %s2901_s15 = sshll.u32 (!%p391_p9), %s3803_s29, 4 }
  0x12   : > { %s432_s16 = scalar_lea.vmem (!%p391_p9), [#allocation2], %s431_s19  ;;  %s4995_s23 = scalar_lea.hbm (!%p391_p9), %s5043_s13, %s2901_s15 }
  0x13   : > { %s2610_s30 = scalar_lea.sflag (!%p391_p9), [#allocation3], %s431_s19 }
  0x16   : > { %v2690_v0 = vld [vmem:[%s5031_s1 + $0x78] sm:$0xf]  ;;  %vm478_vm0 = vcmask 1043456   ;;  %v2689_v1 = vld [vmem:[%s5031_s1 + $0x70] sm:$0xf]  ;;  %v2688_v2 = vld [vmem:[%s5031_s1 + $0x68] sm:$0xff] }
  0x17   : > { %3562 = vmatprep.subr.msk.mxu1 %vm478_vm0, %v2690_v0  ;;  %2691 = vmatprep.subr.msk.mxu0 %vm478_vm0, %v2690_v0  ;;  %v2687_v3 = vld [vmem:[%s5031_s1 + $0x60] sm:$0xff]  ;;  %v2686_v4 = vld [vmem:[%s5031_s1 + $0x58] sm:$0xff]  ;;  %v2685_v5 = vld [vmem:[%s5031_s1 + $0x50] sm:$0xff]  ;;  %s434_s24 = scalar_select %p433_p10, %s3803_s29, 1  ;;  %vm463_vm1 = vcmask 1046528   ;;  %vm471_vm2 = vcmask 228352  }
  0x18   : > { %3566 = vmatpush1.msk.msra.mxu1 %vm478_vm0, %v2689_v1  ;;  %2692 = vmatpush1.msk.msra.mxu0 %vm478_vm0, %v2689_v1  ;;  %v2684_v6 = vld [vmem:[%s5031_s1 + $0x48] sm:$0xff]  ;;  %v2683_v7 = vld [vmem:[%s5031_s1 + $0x40] sm:$0xff]  ;;  %v449_v8 = vld [vmem:[%s5031_s1 + $0x38] sm:$0xf]  ;;  %v3709_v17 = vmov 0.0   ;;  %vm672_vm3 = vcmask 1045504  }
  0x19   : > { %3563 = vmatprep.subr.mxu1 %v2688_v2  ;;  %511 = vmatprep.subr.mxu0 %v2688_v2  ;;  %s2904_s20 = sshll.u32 %s434_s24, 5  ;;  %v2708_v9 = vld [vmem:[%s5031_s1 + $0xb8] sm:$0xf]  ;;  %v2707_v19 = vld [vmem:[%s5031_s1 + $0xb0] sm:$0xf]  ;;  %v2706_v22 = vld [vmem:[%s5031_s1 + $0xa8] sm:$0xff] }
  0x1a   : > { %3567 = vmatpush1.msra.mxu1 %v2687_v3  ;;  %512 = vmatpush1.msra.mxu0 %v2687_v3  ;;  %s437_s14 = scalar_lea.vmem %s5030_s0, %s2904_s20  ;;  %v448_v21 = vld [vmem:[%s5031_s1 + $0x30] sm:$0xf]  ;;  %v447_v24 = vld [vmem:[%s5031_s1 + $0x28] sm:$0xff]  ;;  %v446_v25 = vld [vmem:[%s5031_s1 + $0x20] sm:$0xff]  ;;  %vm790_vm4 = vcmask 1044480   ;;  %vm1072_vm5 = vcmask 195584  }
  0x1b   : > { %3564 = vmatprep.subr.mxu1 %v2686_v4  ;;  %513 = vmatprep.subr.mxu0 %v2686_v4  ;;  %v3869_v10 = vld [vmem:[%s437_s14] sm:$0xff]  ;;  %v3871_v11 = vld [vmem:[%s437_s14 + $0x8] sm:$0xff]  ;;  %v3873_v12 = vld [vmem:[%s437_s14 + $0x10] sm:$0xff]  ;;  %vm1174_vm6 = vcmask 130048   ;;  %vm3710_vm7 = vmmov 0   ;;  %vm1280_vm8 = vcmask 588800  }
  0x1c   : > { %3568 = vmatpush1.msra.mxu1 %v2685_v5  ;;  %514 = vmatpush1.msra.mxu0 %v2685_v5  ;;  %v464_v13 = vrot.slane %v3869_v10, 1  ;;  %v465_v14 = vrot.slane %v3871_v11, 1  ;;  %v3877_v15 = vld [vmem:[%s437_s14 + $0x18] sm:$0xf]  ;;  %v467_v16 = vrot.slane %v3873_v12, 1  ;;  %v2705_v26 = vld [vmem:[%s5031_s1 + $0xa0] sm:$0xff] }
  0x1d   : > { %3565 = vmatprep.subr.mxu1 %v2684_v6  ;;  %515 = vmatprep.subr.mxu0 %v2684_v6  ;;  %v469_v18 = vrot.slane %v3877_v15, 1  ;;  %v445_v27 = vld [vmem:[%s5031_s1 + $0x18] sm:$0xff]  ;;  %v444_v29 = vld [vmem:[%s5031_s1 + $0x10] sm:$0xff]  ;;  %v443_v31 = vld [vmem:[%s5031_s1 + $0x8] sm:$0xff]  ;;  %v673_v33 = vrot.slane %v3869_v10, 2  ;;  %v674_v34 = vrot.slane %v3871_v11, 2 }
  0x1e   : > { %3569 = vmatpush1.msra.mxu1 %v2683_v7  ;;  %516 = vmatpush1.msra.mxu0 %v2683_v7  ;;  %v466_v20 = vsel %vm463_vm1, %v464_v13, %v465_v14  ;;  %v468_v28 = vsel %vm463_vm1, %v465_v14, %v467_v16  ;;  %v2704_v30 = vld [vmem:[%s5031_s1 + $0x98] sm:$0xff]  ;;  %v2703_v32 = vld [vmem:[%s5031_s1 + $0x90] sm:$0xff]  ;;  %v442_v35 = vld [vmem:[%s5031_s1] sm:$0xff]  ;;  %v676_v39 = vrot.slane %v3873_v12, 2  ;;  %v678_v47 = vrot.slane %v3877_v15, 2  ;;  %s2622_s20 = sshll.u32 %s432_s16, 4  ;;  %s2623_s20 = int_to_ptr.vmem [resolvable:$true] %s2622_s20 }
  0x1f   : > { %549 = vmatprep.mubr.f32.mxu0 %v3709_v17  ;;  %561 = vmatprep.mubr.f32.mxu1 %v3709_v17  ;;  %v470_v23 = vsel %vm463_vm1, %v467_v16, %v469_v18  ;;  %v2702_v36 = vld [vmem:[%s5031_s1 + $0x88] sm:$0xff]  ;;  %v2701_v37 = vld [vmem:[%s5031_s1 + $0x80] sm:$0xff]  ;;  %v675_v38 = vsel %vm672_vm3, %v673_v33, %v674_v34  ;;  %v2721_v40 = vld [vmem:[%s5031_s1 + $0xf8] sm:$0xf]  ;;  %v791_v52 = vrot.slane %v3869_v10, 3  ;;  %v792_v53 = vrot.slane %v3871_v11, 3 }
  0x20   : > { %2696 = vmatprep.subr.msk.mxu1 %vm478_vm0, %v449_v8  ;;  %2709 = vmatprep.subr.msk.mxu0 %vm478_vm0, %v2708_v9  ;;  %v2734_v41 = vld [vmem:[%s5031_s1 + $0x138] sm:$0xf]  ;;  %v2720_v42 = vld [vmem:[%s5031_s1 + $0xf0] sm:$0xf]  ;;  %v677_v44 = vsel %vm672_vm3, %v674_v34, %v676_v39  ;;  %v2719_v45 = vld [vmem:[%s5031_s1 + $0xe8] sm:$0xff]  ;;  %v679_v54 = vsel %vm672_vm3, %v676_v39, %v678_v47  ;;  %v908_v58 = vrot.slane %v3869_v10, 4  ;;  %v1018_v39 = vlaneseq }
  0x21   : > { %2693 = vmatmul.mubr.msk.f32.vlgmr.msra.gmra.mxu0 %vm471_vm2, %v466_v20  ;;  %2695 = vmatmul.mubr.msk.f32.vlgmr.msra.gmra.mxu1 %vm471_vm2, %v470_v23  ;;  %v2733_v43 = vld [vmem:[%s5031_s1 + $0x130] sm:$0xf]  ;;  %v2718_v46 = vld [vmem:[%s5031_s1 + $0xe0] sm:$0xff]  ;;  %v2732_v48 = vld [vmem:[%s5031_s1 + $0x128] sm:$0xff]  ;;  %v909_v59 = vrot.slane %v3871_v11, 4  ;;  %v793_v62 = vsel %vm790_vm4, %v791_v52, %v792_v53  ;;  %v794_v63 = vrot.slane %v3873_v12, 3 }
  0x22   : > { %2710 = vmatpush1.msk.msra.mxu0 %vm478_vm0, %v2707_v19  ;;  %2697 = vmatpush1.msk.msra.mxu1 %vm478_vm0, %v448_v21  ;;  %v2717_v49 = vld [vmem:[%s5031_s1 + $0xd8] sm:$0xff]  ;;  %v2731_v50 = vld [vmem:[%s5031_s1 + $0x120] sm:$0xff]  ;;  %v2716_v51 = vld [vmem:[%s5031_s1 + $0xd0] sm:$0xff]  ;;  %v911_v2 = vrot.slane %v3873_v12, 4  ;;  %v796_v4 = vrot.slane %v3877_v15, 3  ;;  %v913_v6 = vrot.slane %v3877_v15, 4 }
  0x23   : > { %718 = vmatprep.subr.mxu0 %v2706_v22  ;;  %606 = vmatprep.subr.mxu1 %v447_v24  ;;  %v2730_v55 = vld [vmem:[%s5031_s1 + $0x118] sm:$0xff]  ;;  %v2715_v56 = vld [vmem:[%s5031_s1 + $0xc8] sm:$0xff]  ;;  %v2729_v57 = vld [vmem:[%s5031_s1 + $0x110] sm:$0xff]  ;;  %v910_v1 = vsel %vm478_vm0, %v908_v58, %v909_v59  ;;  %v795_v3 = vsel %vm790_vm4, %v792_v53, %v794_v63  ;;  %vm2438_vm9 = vcmask 982016   ;;  %vm2530_vm10 = vcmask 687104   ;;  %s3647_s27 = scalar_lea.vmem %s2623_s20, 16 }
  0x24   : > { %555 = vmatprep.mubr.f32.mxu0 %v3709_v17  ;;  %607 = vmatpush1.msra.mxu1 %v446_v25  ;;  %v2714_v60 = vld [vmem:[%s5031_s1 + $0xc0] sm:$0xff]  ;;  %v2728_v61 = vld [vmem:[%s5031_s1 + $0x108] sm:$0xff]  ;;  %v912_v5 = vsel %vm478_vm0, %v909_v59, %v911_v2  ;;  %v797_v7 = vsel %vm790_vm4, %v794_v63, %v796_v4  ;;  %v914_v8 = vsel %vm478_vm0, %v911_v2, %v913_v6  ;;  %v1171_v9 = vld [vmem:[%s5034_s4 + $0x78] sm:$0xff]  ;;  %vm2607_vm11 = vcmask 73728   ;;  %p3648_p11 = scmp.ne.s32.totalorder %s2623_s20, %s3647_s27  ;;  %s3711_s29 = smov [#allocation2]  }
  0x25   : > { %719 = vmatpush1.msra.mxu0 %v2705_v26  ;;  %608 = vmatprep.subr.mxu1 %v445_v27  ;;  %v2727_v0 = vld [vmem:[%s5031_s1 + $0x100] sm:$0xff]  ;;  %v1167_v13 = vld [vmem:[%s5034_s4 + $0x58] sm:$0xff]  ;;  %v1166_v14 = vld [vmem:[%s5034_s4 + $0x50] sm:$0xff]  ;;  %s3651_s17 = sshll.u32 %s3711_s29, 4  ;;  %s3652_s17 = int_to_ptr.vmem [resolvable:$false] %s3651_s17 }
  0x26   : > { %2694 = vmatmul.mubr.msk.f32.gmra.mxu0 %vm471_vm2, %v468_v28  ;;  %609 = vmatpush1.msra.mxu1 %v444_v29  ;;  %v1165_v15 = vld [vmem:[%s5034_s4 + $0x48] sm:$0xff]  ;;  %v1164_v16 = vld [vmem:[%s5034_s4 + $0x40] sm:$0xff]  ;;  %v1163_v18 = vld [vmem:[%s5034_s4 + $0x38] sm:$0xff]  ;;  %p3649_p12 = pnand %p3648_p11, %p3820_p5  ;;  %s3653_s14 = scalar_lea.vmem %s3652_s17, 32 }
  0x27   : > { %720 = vmatprep.subr.mxu0 %v2704_v30  ;;  %610 = vmatprep.subr.mxu1 %v443_v31  ;;  %v1162_v19 = vld [vmem:[%s5034_s4 + $0x30] sm:$0xff]  ;;  %v1161_v20 = vld [vmem:[%s5034_s4 + $0x28] sm:$0xff]  ;;  %v1160_v21 = vld [vmem:[%s5034_s4 + $0x20] sm:$0xff]  ;;  %p3654_p0 = scmp.lt.s32.totalorder %s2623_s20, %s3652_s17  ;;  %p3655_p1 = scmp.lt.s32.totalorder %s3653_s14, %s3647_s27 }
  0x28   : > { %721 = vmatpush1.msra.mxu0 %v2703_v32  ;;  %611 = vmatpush1.msra.mxu1 %v442_v35  ;;  %v1159_v22 = vld [vmem:[%s5034_s4 + $0x18] sm:$0xff]  ;;  %v1158_v23 = vld [vmem:[%s5034_s4 + $0x10] sm:$0xff]  ;;  %v1157_v24 = vld [vmem:[%s5034_s4 + $0x8] sm:$0xff]  ;;  %p3650_p13 = pneg %p3649_p12 }
  0x29   : > { %644 = vmatprep.mubr.f32.mxu1 %v3709_v17  ;;  %722 = vmatprep.subr.mxu0 %v2702_v36  ;;  %v1156_v25 = vld [vmem:[%s5034_s4] sm:$0xff]  ;;  %p3656_p2 = por %p3655_p1, %p3654_p0 }
  0x2a   : > { %2698 = vmatmul.mubr.msk.f32.vlgmr.msra.gmra.mxu1 %vm471_vm2, %v3869_v10  ;;  %723 = vmatpush1.msra.mxu0 %v2701_v37  ;;  %v1170_v10 = vld [vmem:[%s5034_s4 + $0x70] sm:$0xff] }
  0x2b   : > { %756 = vmatprep.mubr.f32.mxu0 %v3709_v17  ;;  %650 = vmatprep.mubr.f32.mxu1 %v3709_v17  ;;  %p3657_p3 = pnand %p3656_p2, %p3650_p13 }
  0x2c   : > { %2711 = vmatmul.mubr.msk.f32.vlgmr.msra.gmra.mxu0 %vm471_vm2, %v675_v38  ;;  %2722 = vmatprep.subr.msk.mxu1 %vm478_vm0, %v2721_v40 }
  0x2d   : > { %762 = vmatprep.mubr.f32.mxu0 %v3709_v17  ;;  %2735 = vmatprep.subr.msk.mxu0 %vm478_vm0, %v2734_v41 }
  0x2e   : > { %2699 = vmatmul.mubr.msk.f32.gmra.mxu1 %vm471_vm2, %v3871_v11  ;;  %2736 = vmatpush1.msk.msra.mxu0 %vm478_vm0, %v2733_v43  ;;  %v1169_v11 = vld [vmem:[%s5034_s4 + $0x68] sm:$0xff] }
  0x2f   : > { %2723 = vmatpush1.msk.msra.mxu1 %vm478_vm0, %v2720_v42  ;;  %656 = vmatprep.mubr.f32.mxu1 %v3709_v17 }
  0x30   : > { %2712 = vmatmul.mubr.msk.f32.gmra.mxu0 %vm471_vm2, %v677_v44  ;;  %836 = vmatprep.subr.mxu1 %v2719_v45 }
  0x31   : > { %837 = vmatpush1.msra.mxu1 %v2718_v46  ;;  %953 = vmatprep.subr.mxu0 %v2732_v48  ;;  %v1019_v46 = vshrl.u32 %v1018_v39, 7 }
  0x32   : > { %2700 = vmatmul.mubr.msk.f32.gmra.mxu1 %vm471_vm2, %v3873_v12  ;;  %768 = vmatprep.mubr.f32.mxu0 %v3709_v17  ;;  %v1168_v12 = vld [vmem:[%s5034_s4 + $0x60] sm:$0xff] }
  0x33   : > { %838 = vmatprep.subr.mxu1 %v2717_v49  ;;  %954 = vmatpush1.msra.mxu0 %v2731_v50  ;;  %v1024_v49 = vsub.s32 1, %v1019_v46 }
  0x34   : > { %839 = vmatpush1.msra.mxu1 %v2716_v51  ;;  %2713 = vmatmul.mubr.msk.f32.gmra.mxu0 %vm471_vm2, %v679_v54 }
  0x35   : > { %955 = vmatprep.subr.mxu0 %v2730_v55  ;;  %840 = vmatprep.subr.mxu1 %v2715_v56  ;;  %v1016_v55 = vld [vmem:[%s5032_s2] sm:$0x3]  ;;  %v1020_v56 = vsub.s32 0, %v1019_v46 }
  0x36   : > { %956 = vmatpush1.msra.mxu0 %v2729_v57  ;;  %841 = vmatpush1.msra.mxu1 %v2714_v60 }
  0x37   : > { %874 = vmatprep.mubr.f32.mxu1 %v3709_v17  ;;  %957 = vmatprep.subr.mxu0 %v2728_v61  ;;  %v1025_v61 = vrot.slane %v1016_v55, %v1024_v49 }
  0x38   : > { %2724 = vmatmul.mubr.msk.f32.vlgmr.msra.gmra.mxu1 %vm471_vm2, %v793_v62  ;;  %958 = vmatpush1.msra.mxu0 %v2727_v0 }
  0x39   : > { %991 = vmatprep.mubr.f32.mxu0 %v3709_v17  ;;  %880 = vmatprep.mubr.f32.mxu1 %v3709_v17 }
  0x3a   : > { %2737 = vmatmul.mubr.msk.f32.vlgmr.msra.gmra.mxu0 %vm471_vm2, %v910_v1  ;;  %1181 = vmatprep.subr.mxu0 %v3709_v17 }
  0x3b   : > { %997 = vmatprep.mubr.f32.mxu0 %v3709_v17  ;;  %1182 = vmatpush1.msra.mxu0 %v1171_v9 }
  0x3c   : > { %2725 = vmatmul.mubr.msk.f32.gmra.mxu1 %vm471_vm2, %v795_v3  ;;  %1183 = vmatprep.subr.mxu0 %v3709_v17 }
  0x3d   : > { %886 = vmatprep.mubr.f32.mxu1 %v3709_v17  ;;  %1184 = vmatpush1.msra.mxu0 %v1170_v10 }
  0x3e   : > { %2738 = vmatmul.mubr.msk.f32.gmra.mxu0 %vm471_vm2, %v912_v5  ;;  %1185 = vmatprep.subr.mxu0 %v3709_v17  ;;  %v1021_v5 = vrot.slane %v1016_v55, %v1020_v56 }
  0x3f   : > { %1003 = vmatprep.mubr.f32.mxu0 %v3709_v17  ;;  %1186 = vmatpush1.msra.mxu0 %v1169_v11 }
  0x40   : > { %2726 = vmatmul.mubr.msk.f32.gmra.mxu1 %vm471_vm2, %v797_v7  ;;  %1187 = vmatprep.subr.mxu0 %v3709_v17 }
  0x41   : > { %1143 = vmatprep.mubr.f32.mxu1 %v3709_v17  ;;  %1188 = vmatpush1.msra.mxu0 %v1168_v12 }
  0x42   : > { %2739 = vmatmul.mubr.msk.f32.gmra.mxu0 %vm471_vm2, %v914_v8  ;;  %1189 = vmatprep.subr.mxu0 %v3709_v17 }
  0x43   : > { %1190 = vmatpush1.msra.mxu0 %v1167_v13 }
  0x44   : > { %1191 = vmatprep.subr.mxu0 %v3709_v17 }
  0x45   : > { %1192 = vmatpush1.msra.mxu0 %v1166_v14 }
  0x46   : > { %1193 = vmatprep.subr.mxu0 %v3709_v17 }
  0x47   : > { %1194 = vmatpush1.msra.mxu0 %v1165_v15 }
  0x48   : > { %1195 = vmatprep.subr.mxu0 %v3709_v17 }
  0x49   : > { %1196 = vmatpush1.msra.mxu0 %v1164_v16 }
  0x4a   : > { %1197 = vmatprep.subr.mxu0 %v3709_v17 }
  0x4b   : > { %1198 = vmatpush1.msra.mxu0 %v1163_v18 }
  0x4c   : > { %1199 = vmatprep.subr.mxu0 %v3709_v17 }
  0x4d   : > { %1200 = vmatpush1.msra.mxu0 %v1162_v19 }
  0x4e   : > { %1201 = vmatprep.subr.mxu0 %v3709_v17 }
  0x4f   : > { %1202 = vmatpush1.msra.mxu0 %v1161_v20 }
  0x50   : > { %1203 = vmatprep.subr.mxu0 %v3709_v17 }
  0x51   : > { %1204 = vmatpush1.msra.mxu0 %v1160_v21 }
  0x52   : > { %1205 = vmatprep.subr.mxu0 %v3709_v17 }
  0x53   : > { %1206 = vmatpush1.msra.mxu0 %v1159_v22 }
  0x54   : > { %1207 = vmatprep.subr.mxu0 %v3709_v17 }
  0x55   : > { %1208 = vmatpush1.msra.mxu0 %v1158_v23 }
  0x56   : > { %1209 = vmatprep.subr.mxu0 %v3709_v17 }
  0x57   : > { %1210 = vmatpush1.msra.mxu0 %v1157_v24 }
  0x58   : > { %1211 = vmatprep.subr.mxu0 %v3709_v17 }
  0x59   : > { %1212 = vmatpush1.msra.mxu0 %v1156_v25 }
  0x5a   : > { %1241 = vmatprep.subr.mxu0 %v3709_v17 }
  0xe1   : > { %v551_v26 = vpop.f32.mrf.mxu0  ;;  %v563_v28 = vpop.f32.mrf.mxu1 }
  0xe3   : > { %v553_v27 = vpop.f32.mrf.mxu0  ;;  %v565_v30 = vpop.f32.mrf.mxu1 }
  0xe6   : > { %v557_v29 = vpop.f32.mrf.mxu0 }
  0xe8   : > { %v559_v31 = vpop.f32.mrf.mxu0 }
  0xea   : > { %v646_v32 = vpop.f32.mrf.mxu1 }
  0xeb   : > { %v647_v43 = vadd.f32 %v646_v32, %v551_v26 }
  0xec   : > { %v758_v33 = vpop.f32.mrf.mxu0  ;;  %v648_v34 = vpop.f32.mrf.mxu1 }
  0xed   : > { %v649_v44 = vadd.f32 %v648_v34, %v553_v27  ;;  %v775_v51 = vadd.f32 %v758_v33, %v647_v43 }
  0xee   : > { %v760_v35 = vpop.f32.mrf.mxu0  ;;  %v652_v36 = vpop.f32.mrf.mxu1 }
  0xef   : > { %v653_v47 = vadd.f32 %v652_v36, %v557_v29  ;;  %v776_v52 = vadd.f32 %v760_v35, %v649_v44 }
  0xf0   : > { %v764_v37 = vpop.f32.mrf.mxu0  ;;  %v654_v38 = vpop.f32.mrf.mxu1 }
  0xf1   : > { %v655_v53 = vadd.f32 %v654_v38, %v559_v31  ;;  %v777_v58 = vadd.f32 %v764_v37, %v653_v47 }
  0xf2   : > { %v766_v40 = vpop.f32.mrf.mxu0  ;;  %v658_v41 = vpop.f32.mrf.mxu1 }
  0xf3   : > { %v659_v62 = vadd.f32 %v658_v41, %v563_v28  ;;  %v778_v1 = vadd.f32 %v766_v40, %v655_v53 }
  0xf4   : > { %v660_v42 = vpop.f32.mrf.mxu1  ;;  %v770_v45 = vpop.f32.mrf.mxu0 }
  0xf5   : > { %v661_v4 = vadd.f32 %v660_v42, %v565_v30  ;;  %v779_v12 = vadd.f32 %v770_v45, %v659_v62  ;;  %v1173_v62 = vld [vmem:[%s5034_s4 + $0x88] sm:$0xff] }
  0xf6   : > { %v772_v48 = vpop.f32.mrf.mxu0  ;;  %1242 = vmatpush2.msra.mxu0 %v1173_v62 }
  0xf7   : > { %v780_v18 = vadd.f32 %v772_v48, %v661_v4  ;;  %1243 = vmatprep.subr.mxu0 %v3709_v17  ;;  %v2748_v4 = vld [vmem:[%s5035_s5 + $0x68] sm:$0xff] }
  0xf8   : > { %v876_v50 = vpop.f32.mrf.mxu1 }
  0xf9   : > { %v893_v59 = vadd.f32 %v876_v50, %v775_v51 }
  0xfa   : > { %v993_v54 = vpop.f32.mrf.mxu0  ;;  %v878_v57 = vpop.f32.mrf.mxu1 }
  0xfb   : > { %v894_v60 = vadd.f32 %v878_v57, %v776_v52  ;;  %v1010_v8 = vadd.f32 %v993_v54, %v893_v59  ;;  %v1070_v59 = vld [vmem:[%s5033_s3] sm:$0xff] }
  0xfc   : > { %v995_v63 = vpop.f32.mrf.mxu0  ;;  %v882_v0 = vpop.f32.mrf.mxu1 }
  0xfd   : > { %v1011_v2 = vadd.f32 %v995_v63, %v894_v60  ;;  %v895_v3 = vadd.f32 %v882_v0, %v777_v58  ;;  %v1028_v23 = vadd.f32 %v1021_v5, %v1010_v8  ;;  %v1172_v63 = vld [vmem:[%s5034_s4 + $0x80] sm:$0xff]  ;;  %v2752_v0 = vld [vmem:[%s5035_s5 + $0x88] sm:$0xff] }
  0xfe   : > { %v999_v6 = vpop.f32.mrf.mxu0  ;;  %v884_v7 = vpop.f32.mrf.mxu1  ;;  %1244 = vmatpush2.msra.mxu0 %v1172_v63  ;;  %v2765_v63 = vld [vmem:[%s5035_s5 + $0xd8] sm:$0xff] }
  0xff   : > { %v1029_v9 = vadd.f32 %v1025_v61, %v1011_v2  ;;  %v1012_v10 = vadd.f32 %v999_v6, %v895_v3  ;;  %v896_v11 = vadd.f32 %v884_v7, %v778_v1  ;;  %v1034_v33 = vsub.f32 0.0, %v1028_v23  ;;  %3161 = vmatprep.subr.mxu0 %v3709_v17  ;;  %v2751_v1 = vld [vmem:[%s5035_s5 + $0x80] sm:$0xff]  ;;  %v2750_v2 = vld [vmem:[%s5035_s5 + $0x78] sm:$0xff]  ;;  %v2749_v3 = vld [vmem:[%s5035_s5 + $0x70] sm:$0xff] }
 0x100   : > { %v1001_v13 = vpop.f32.mrf.mxu0  ;;  %v888_v14 = vpop.f32.mrf.mxu1  ;;  %v2763_v7 = vld [vmem:[%s5035_s5 + $0xd0] sm:$0xff] }
 0x101   : > { %v1030_v15 = vadd.f32 %v1021_v5, %v1012_v10  ;;  %v1013_v16 = vadd.f32 %v1001_v13, %v896_v11  ;;  %v1035_v19 = vsub.f32 0.0, %v1029_v9  ;;  %v897_v20 = vadd.f32 %v888_v14, %v779_v12  ;;  %v2762_v9 = vld [vmem:[%s5035_s5 + $0xc8] sm:$0xff]  ;;  %v2761_v11 = vld [vmem:[%s5035_s5 + $0xc0] sm:$0xff]  ;;  %v2760_v12 = vld [vmem:[%s5035_s5 + $0xb8] sm:$0xff] }
 0x102   : > { %v1005_v21 = vpop.f32.mrf.mxu0  ;;  %v890_v22 = vpop.f32.mrf.mxu1  ;;  %v1040_v40 = vmul.f32 1.442695, %v1034_v33  ;;  %v2759_v13 = vld [vmem:[%s5035_s5 + $0xb0] sm:$0xff]  ;;  %v2747_v14 = vld [vmem:[%s5035_s5 + $0x60] sm:$0xff] }
 0x103   : > { %v1031_v24 = vadd.f32 %v1025_v61, %v1013_v16  ;;  %v1014_v25 = vadd.f32 %v1005_v21, %v897_v20  ;;  %v898_v26 = vadd.f32 %v890_v22, %v780_v18  ;;  %v1036_v28 = vsub.f32 0.0, %v1030_v15  ;;  %v2758_v15 = vld [vmem:[%s5035_s5 + $0xa8] sm:$0xff]  ;;  %v2746_v16 = vld [vmem:[%s5035_s5 + $0x58] sm:$0xff]  ;;  %v2757_v18 = vld [vmem:[%s5035_s5 + $0xa0] sm:$0xff] }
 0x104   : > { %v1007_v27 = vpop.f32.mrf.mxu0  ;;  %v1042_v30 = vmul.f32 1.442695, %v1035_v19  ;;  %v2745_v19 = vld [vmem:[%s5035_s5 + $0x50] sm:$0xff]  ;;  %v2756_v20 = vld [vmem:[%s5035_s5 + $0x98] sm:$0xff]  ;;  %v2744_v21 = vld [vmem:[%s5035_s5 + $0x48] sm:$0xff] }
 0x105   : > { %v1037_v29 = vsub.f32 0.0, %v1031_v24  ;;  %v1032_v31 = vadd.f32 %v1021_v5, %v1014_v25  ;;  %v1015_v32 = vadd.f32 %v1007_v27, %v898_v26  ;;  %v1044_v37 = vmul.f32 1.442695, %v1036_v28  ;;  %v2755_v22 = vld [vmem:[%s5035_s5 + $0x90] sm:$0xff] }
 0x106   : > { %3611 = vpow2.f32 %v1042_v30 }
 0x107   : > { %v1046_v34 = vmul.f32 1.442695, %v1037_v29  ;;  %v1038_v35 = vsub.f32 0.0, %v1032_v31  ;;  %v1033_v36 = vadd.f32 %v1025_v61, %v1015_v32  ;;  %v1071_v61 = vld [vmem:[%s5033_s3 + $0x8] sm:$0xf]  ;;  %v1264_v31 = vld [vmem:[%s5035_s5 + $0x40] sm:$0xff] }
 0x108   : > { %v2783_v32 = vld [vmem:[%s5035_s5 + $0x160] sm:$0xff] }
 0x109   : > { %v1048_v38 = vmul.f32 1.442695, %v1038_v35  ;;  %v1039_v39 = vsub.f32 0.0, %v1033_v36  ;;  %3613 = vpow2.f32 %v1046_v34  ;;  %v1263_v35 = vld [vmem:[%s5035_s5 + $0x38] sm:$0xff] }
 0x10a   : > { %v2782_v36 = vld [vmem:[%s5035_s5 + $0x158] sm:$0xff] }
 0x10b   : > { %3615 = vpow2.f32 %v1048_v38  ;;  %v1050_v41 = vmul.f32 1.442695, %v1039_v39  ;;  %v2781_v38 = vld [vmem:[%s5035_s5 + $0x150] sm:$0xff]  ;;  %v1261_v39 = vld [vmem:[%s5035_s5 + $0x28] sm:$0xff] }
 0x10c   : > { %3617 = vpow2.f32 %v1044_v37  ;;  %v1262_v37 = vld [vmem:[%s5035_s5 + $0x30] sm:$0xff] }
 0x10d   : > { %3619 = vpow2.f32 %v1050_v41  ;;  %v1260_v41 = vld [vmem:[%s5035_s5 + $0x20] sm:$0xff] }
 0x10e   : > { %3621 = vpow2.f32 %v1040_v40  ;;  %v2780_v40 = vld [vmem:[%s5035_s5 + $0x148] sm:$0xff] }
 0x113   : > { %v3612_v42 = vpop.eup %3611 }
 0x114   : > { %v1053_v52 = vadd.f32 1.0, %v3612_v42  ;;  %v2779_v42 = vld [vmem:[%s5035_s5 + $0x140] sm:$0xff] }
 0x116   : > { %v3614_v43 = vpop.eup %3613 }
 0x117   : > { %v1055_v49 = vadd.f32 1.0, %v3614_v43  ;;  %v1259_v43 = vld [vmem:[%s5035_s5 + $0x18] sm:$0xff] }
 0x118   : > { %v3616_v44 = vpop.eup %3615 }
 0x119   : > { %v3618_v45 = vpop.eup %3617  ;;  %v1056_v47 = vadd.f32 1.0, %v3616_v44  ;;  %v2778_v44 = vld [vmem:[%s5035_s5 + $0x138] sm:$0xff] }
 0x11a   : > { %v3620_v46 = vpop.eup %3619  ;;  %v1054_v51 = vadd.f32 1.0, %v3618_v45  ;;  %v1258_v45 = vld [vmem:[%s5035_s5 + $0x10] sm:$0xff] }
 0x11b   : > { %v3622_v48 = vpop.eup %3621  ;;  %v1057_v50 = vadd.f32 1.0, %v3620_v46  ;;  %v2777_v46 = vld [vmem:[%s5035_s5 + $0x130] sm:$0xff] }
 0x11c   : > { %v1052_v53 = vadd.f32 1.0, %v3622_v48  ;;  %v2776_v48 = vld [vmem:[%s5035_s5 + $0x128] sm:$0xff] }
 0x11d   : > { %3623 = vrcp.f32 %v1057_v50 }
 0x11e   : > { %3625 = vrcp.f32 %v1056_v47  ;;  %v1257_v47 = vld [vmem:[%s5035_s5 + $0x8] sm:$0xff] }
 0x11f   : > { %3627 = vrcp.f32 %v1055_v49  ;;  %v1256_v49 = vld [vmem:[%s5035_s5] sm:$0xff] }
 0x120   : > { %3629 = vrcp.f32 %v1054_v51  ;;  %v2775_v51 = vld [vmem:[%s5035_s5 + $0x120] sm:$0xff] }
 0x121   : > { %3631 = vrcp.f32 %v1053_v52 }
 0x122   : > { %3633 = vrcp.f32 %v1052_v53  ;;  %v2773_v53 = vld [vmem:[%s5035_s5 + $0x118] sm:$0xff] }
 0x12a   : > { %v3624_v54 = vpop.eup %3623 }
 0x12b   : > { %v3626_v55 = vpop.eup %3625  ;;  %1105 = vmatprep.subr.mxu1 %v3624_v54 }
 0x12c   : > { %v3628_v56 = vpop.eup %3627  ;;  %1106 = vmatpush1.msra.mxu1 %v3626_v55  ;;  %v2772_v55 = vld [vmem:[%s5035_s5 + $0x110] sm:$0xff] }
 0x12d   : > { %v3630_v57 = vpop.eup %3629  ;;  %1107 = vmatprep.subr.mxu1 %v3628_v56  ;;  %v2771_v56 = vld [vmem:[%s5035_s5 + $0x108] sm:$0xff] }
 0x12e   : > { %v3632_v58 = vpop.eup %3631  ;;  %1108 = vmatpush1.msra.mxu1 %v3630_v57  ;;  %v2770_v57 = vld [vmem:[%s5035_s5 + $0x100] sm:$0xff] }
 0x12f   : > { %v3634_v60 = vpop.eup %3633  ;;  %1109 = vmatprep.subr.mxu1 %v3632_v58  ;;  %v2769_v58 = vld [vmem:[%s5035_s5 + $0xf8] sm:$0xff] }
 0x130   : > { %1110 = vmatpush1.msra.mxu1 %v3634_v60  ;;  %v2767_v60 = vld [vmem:[%s5035_s5 + $0xe8] sm:$0xff] }
 0x131   : > { %2740 = vmatmul.mubr.msk.f32.vlgmr.msra.gmra.mxu1 %vm1072_vm5, %v1070_v59  ;;  %3119 = vmatprep.subr.mxu1 %v3709_v17  ;;  %v2768_v59 = vld [vmem:[%s5035_s5 + $0xf0] sm:$0xff] }
 0x132   : > { %1149 = vmatprep.mubr.f32.mxu1 %v3709_v17  ;;  %3120 = vmatpush3.msra.mxu1 %v2752_v0 }
 0x133   : > { %3121 = vmatprep.subr.mxu1 %v3709_v17 }
 0x134   : > { %3122 = vmatpush3.msra.mxu1 %v2751_v1 }
 0x135   : > { %2741 = vmatmul.mubr.msk.f32.gmra.mxu1 %vm1072_vm5, %v1071_v61  ;;  %3123 = vmatprep.subr.mxu1 %v3709_v17  ;;  %v2766_v61 = vld [vmem:[%s5035_s5 + $0xe0] sm:$0xff] }
 0x136   : > { %3124 = vmatpush3.msra.mxu1 %v2750_v2  ;;  %3137 = vmatprep.mubr.msk.f32.mxu1 %vm3710_vm7, %v3709_v17  ;;  %v1713_v2 = vld [vmem:[%s5037_s7 + $0x78] sm:$0xff] }
 0x137   : > { %3125 = vmatprep.subr.mxu1 %v3709_v17 }
 0x138   : > { %3126 = vmatpush3.msra.mxu1 %v2749_v3  ;;  %v1712_v3 = vld [vmem:[%s5037_s7 + $0x70] sm:$0xff] }
 0x139   : > { %3127 = vmatprep.subr.mxu1 %v3709_v17 }
 0x13a   : > { %3128 = vmatpush3.msra.mxu1 %v2748_v4  ;;  %v2801_v4 = vld [vmem:[%s5037_s7 + $0xf8] sm:$0xff] }
 0x13b   : > { %3129 = vmatprep.subr.mxu1 %v3709_v17 }
 0x13c   : > { %3130 = vmatpush3.msra.mxu1 %v2747_v14  ;;  %v2796_v14 = vld [vmem:[%s5037_s7 + $0xd0] sm:$0xff] }
 0x13d   : > { %3131 = vmatprep.subr.mxu1 %v3709_v17 }
 0x13e   : > { %3132 = vmatpush3.msra.mxu1 %v2746_v16  ;;  %v2795_v16 = vld [vmem:[%s5037_s7 + $0xc8] sm:$0xff] }
 0x13f   : > { %3133 = vmatprep.subr.mxu1 %v3709_v17 }
 0x140   : > { %3134 = vmatpush3.msra.mxu1 %v2745_v19  ;;  %v2794_v19 = vld [vmem:[%s5037_s7 + $0xc0] sm:$0xff] }
 0x141   : > { %3135 = vmatprep.subr.mxu1 %v3709_v17 }
 0x142   : > { %3136 = vmatpush3.msra.mxu1 %v2744_v21  ;;  %v2793_v21 = vld [vmem:[%s5037_s7 + $0xb8] sm:$0xff] }
 0x143   : > { %3140 = vmatprep.subr.mxu1 %v3709_v17 }
 0x1f1   : > { %v1145_v5 = vpop.f32.mrf.mxu1 }
 0x1f3   : > { %v1147_v6 = vpop.f32.mrf.mxu1 }
 0x1f4   : > { %2742 = vmatprep.mubr.msk.f32.mxu0 %vm1174_vm6, %v1147_v6  ;;  %v2800_v6 = vld [vmem:[%s5037_s7 + $0xf0] sm:$0xff] }
 0x1f5   : > { %v1151_v8 = vpop.f32.mrf.mxu1  ;;  %1246 = vmatmul.mubr.f32.vlgmr.msra.gmra.mxu0 %v1145_v5  ;;  %v1711_v5 = vld [vmem:[%s5037_s7 + $0x68] sm:$0xff] }
 0x1f6   : > { %3162 = vmatpush3.msra.mxu0 %v2763_v7  ;;  %v1710_v7 = vld [vmem:[%s5037_s7 + $0x60] sm:$0xff] }
 0x1f7   : > { %v1153_v10 = vpop.f32.mrf.mxu1  ;;  %3163 = vmatprep.subr.mxu0 %v3709_v17 }
 0x1f8   : > { %2743 = vmatprep.mubr.msk.f32.mxu0 %vm1174_vm6, %v1153_v10  ;;  %3164 = vmatpush3.msra.mxu0 %v2762_v9  ;;  %v1709_v9 = vld [vmem:[%s5037_s7 + $0x58] sm:$0xff]  ;;  %v2798_v10 = vld [vmem:[%s5037_s7 + $0xe0] sm:$0xff] }
 0x1f9   : > { %1251 = vmatmul.mubr.f32.gmra.mxu0 %v1151_v8  ;;  %3165 = vmatprep.subr.mxu0 %v3709_v17  ;;  %v2799_v8 = vld [vmem:[%s5037_s7 + $0xe8] sm:$0xff] }
 0x1fa   : > { %3166 = vmatpush3.msra.mxu0 %v2761_v11  ;;  %3179 = vmatprep.mubr.msk.f32.mxu0 %vm3710_vm7, %v3709_v17  ;;  %v1708_v11 = vld [vmem:[%s5037_s7 + $0x50] sm:$0xff] }
 0x1fb   : > { %3167 = vmatprep.subr.mxu0 %v3709_v17 }
 0x1fc   : > { %3168 = vmatpush3.msra.mxu0 %v2760_v12  ;;  %v2797_v12 = vld [vmem:[%s5037_s7 + $0xd8] sm:$0xff] }
 0x1fd   : > { %3169 = vmatprep.subr.mxu0 %v3709_v17 }
 0x1fe   : > { %3170 = vmatpush3.msra.mxu0 %v2759_v13  ;;  %v1707_v13 = vld [vmem:[%s5037_s7 + $0x48] sm:$0xff] }
 0x1ff   : > { %3171 = vmatprep.subr.mxu0 %v3709_v17 }
 0x200   : > { %3172 = vmatpush3.msra.mxu0 %v2758_v15  ;;  %v1706_v15 = vld [vmem:[%s5037_s7 + $0x40] sm:$0xff] }
 0x201   : > { %3173 = vmatprep.subr.mxu0 %v3709_v17 }
 0x202   : > { %3174 = vmatpush3.msra.mxu0 %v2757_v18  ;;  %v1705_v18 = vld [vmem:[%s5037_s7 + $0x38] sm:$0xff] }
 0x203   : > { %3175 = vmatprep.subr.mxu0 %v3709_v17 }
 0x204   : > { %3176 = vmatpush3.msra.mxu0 %v2756_v20  ;;  %v1704_v20 = vld [vmem:[%s5037_s7 + $0x30] sm:$0xff] }
 0x205   : > { %3177 = vmatprep.subr.mxu0 %v3709_v17 }
 0x206   : > { %3178 = vmatpush3.msra.mxu0 %v2755_v22  ;;  %v1703_v22 = vld [vmem:[%s5037_s7 + $0x28] sm:$0xff] }
 0x207   : > { %3203 = vmatprep.subr.mxu0 %v3709_v17 }
 0x2b5   : > { %v4197_v23 = vpop.f32.mrf.mxu0 }
 0x2b6   : > { %v1277_v26 = vrot.slane %v4197_v23, 1  ;;  %v1435_v27 = vrot.slane %v4197_v23, 2  ;;  %v1607_v52 = vrot.slane %v4197_v23, 4  ;;  %v1521_v0 = vrot.slane %v4197_v23, 3 }
 0x2b7   : > { %v1249_v24 = vpop.f32.mrf.mxu0 }
 0x2b8   : > { %v1702_v24 = vld [vmem:[%s5037_s7 + $0x20] sm:$0xff] }
 0x2b9   : > { %v4199_v25 = vpop.f32.mrf.mxu0 }
 0x2ba   : > { %v1278_v28 = vrot.slane %v4199_v25, 1  ;;  %v1436_v29 = vrot.slane %v4199_v25, 2  ;;  %v1608_v50 = vrot.slane %v4199_v25, 4  ;;  %v1522_v62 = vrot.slane %v4199_v25, 3  ;;  %v2791_v25 = vld [vmem:[%s5037_s7 + $0xa8] sm:$0xff] }
 0x2bb   : > { %v1254_v30 = vpop.f32.mrf.mxu0 }
 0x2bc   : > { %v1279_v33 = vsel %vm463_vm1, %v1277_v26, %v1278_v28  ;;  %v1437_v34 = vsel %vm672_vm3, %v1435_v27, %v1436_v29  ;;  %v1609_v54 = vsel %vm478_vm0, %v1607_v52, %v1608_v50  ;;  %v1523_v1 = vsel %vm790_vm4, %v1521_v0, %v1522_v62  ;;  %v1701_v26 = vld [vmem:[%s5037_s7 + $0x18] sm:$0xff]  ;;  %v2790_v27 = vld [vmem:[%s5037_s7 + $0xa0] sm:$0xff]  ;;  %v1700_v28 = vld [vmem:[%s5037_s7 + $0x10] sm:$0xff] }
 0x2bd   : > { %3138 = vmatmul.mubr.msk.f32.vlgmr.msra.gmra.mxu1 %vm1280_vm8, %v1279_v33  ;;  %3180 = vmatmul.mubr.msk.f32.vlgmr.msra.gmra.mxu0 %vm1280_vm8, %v1437_v34  ;;  %v2789_v29 = vld [vmem:[%s5037_s7 + $0x98] sm:$0xff]  ;;  %v1699_v30 = vld [vmem:[%s5037_s7 + $0x8] sm:$0xff]  ;;  %v2786_v34 = vld [vmem:[%s5037_s7 + $0x80] sm:$0xff] }
 0x2be   : > { %3141 = vmatpush3.msra.mxu1 %v1264_v31  ;;  %3204 = vmatpush3.msra.mxu0 %v2783_v32  ;;  %v2788_v31 = vld [vmem:[%s5037_s7 + $0x90] sm:$0xff]  ;;  %v1698_v32 = vld [vmem:[%s5037_s7] sm:$0xff]  ;;  %v2787_v33 = vld [vmem:[%s5037_s7 + $0x88] sm:$0xff] }
 0x2bf   : > { %3142 = vmatprep.subr.mxu1 %v3709_v17  ;;  %3205 = vmatprep.subr.mxu0 %v3709_v17  ;;  %v2814_v62 = vld [vmem:[%s5037_s7 + $0x160] sm:$0xff]  ;;  %v2813_v0 = vld [vmem:[%s5037_s7 + $0x158] sm:$0xff] }
 0x2c0   : > { %3143 = vmatpush3.msra.mxu1 %v1263_v35  ;;  %3206 = vmatpush3.msra.mxu0 %v2782_v36 }
 0x2c1   : > { %3144 = vmatprep.subr.mxu1 %v3709_v17  ;;  %3207 = vmatprep.subr.mxu0 %v3709_v17 }
 0x2c2   : > { %3145 = vmatpush3.msra.mxu1 %v1262_v37  ;;  %3208 = vmatpush3.msra.mxu0 %v2781_v38 }
 0x2c3   : > { %3146 = vmatprep.subr.mxu1 %v3709_v17  ;;  %3209 = vmatprep.subr.mxu0 %v3709_v17 }
 0x2c4   : > { %3147 = vmatpush3.msra.mxu1 %v1261_v39  ;;  %3210 = vmatpush3.msra.mxu0 %v2780_v40 }
 0x2c5   : > { %3148 = vmatprep.subr.mxu1 %v3709_v17  ;;  %3211 = vmatprep.subr.mxu0 %v3709_v17 }
 0x2c6   : > { %3149 = vmatpush3.msra.mxu1 %v1260_v41  ;;  %3212 = vmatpush3.msra.mxu0 %v2779_v42 }
 0x2c7   : > { %3150 = vmatprep.subr.mxu1 %v3709_v17  ;;  %3213 = vmatprep.subr.mxu0 %v3709_v17 }
 0x2c8   : > { %3151 = vmatpush3.msra.mxu1 %v1259_v43  ;;  %3214 = vmatpush3.msra.mxu0 %v2778_v44 }
 0x2c9   : > { %3152 = vmatprep.subr.mxu1 %v3709_v17  ;;  %3215 = vmatprep.subr.mxu0 %v3709_v17 }
 0x2ca   : > { %3153 = vmatpush3.msra.mxu1 %v1258_v45  ;;  %3216 = vmatpush3.msra.mxu0 %v2777_v46 }
 0x2cb   : > { %3154 = vmatprep.subr.mxu1 %v3709_v17  ;;  %3217 = vmatprep.subr.mxu0 %v3709_v17 }
 0x2cc   : > { %3155 = vmatpush3.msra.mxu1 %v1257_v47  ;;  %3218 = vmatpush3.msra.mxu0 %v2776_v48  ;;  %v2785_v47 = vld [vmem:[%s5036_s6] ss:$0 sm:$0xff] }
 0x2cd   : > { %3156 = vmatprep.subr.mxu1 %v3709_v17  ;;  %3219 = vmatprep.subr.mxu0 %v3709_v17 }
 0x2ce   : > { %3157 = vmatpush3.msra.mxu1 %v1256_v49  ;;  %3158 = vmatprep.mubr.msk.f32.mxu1 %vm3710_vm7, %v3709_v17 }
 0x2cf   : > { %3220 = vmatpush3.msra.mxu0 %v2775_v51  ;;  %3221 = vmatprep.mubr.msk.f32.mxu0 %vm3710_vm7, %v3709_v17 }
 0x2d0   : > { %3159 = vmatmul.mubr.msk.f32.vlgmr.msra.gmra.mxu1 %vm1280_vm8, %v4197_v23  ;;  %3182 = vmatprep.subr.mxu1 %v3709_v17  ;;  %v2792_v23 = vld [vmem:[%s5037_s7 + $0xb0] sm:$0xff] }
 0x2d1   : > { %3222 = vmatmul.mubr.msk.f32.vlgmr.msra.gmra.mxu0 %vm1280_vm8, %v1609_v54  ;;  %3183 = vmatpush3.msra.mxu1 %v2773_v53 }
 0x2d2   : > { %3184 = vmatprep.subr.mxu1 %v3709_v17  ;;  %3200 = vmatprep.mubr.msk.f32.mxu1 %vm3710_vm7, %v3709_v17 }
 0x2d3   : > { %3185 = vmatpush3.msra.mxu1 %v2772_v55  ;;  %3259 = vmatprep.subr.mxu0 %v3709_v17  ;;  %v2817_v55 = vld [vmem:[%s5037_s7 + $0x178] sm:$0xff] }
 0x2d4   : > { %3186 = vmatprep.subr.mxu1 %v3709_v17  ;;  %3291 = vmatprep.mubr.msk.f32.mxu0 %vm3710_vm7, %v3709_v17 }
 0x2d5   : > { %3187 = vmatpush3.msra.mxu1 %v2771_v56  ;;  %3260 = vmatpush3.msra.mxu0 %v2801_v4  ;;  %v2811_v4 = vld [vmem:[%s5037_s7 + $0x148] sm:$0xff] }
 0x2d6   : > { %3188 = vmatprep.subr.mxu1 %v3709_v17  ;;  %3261 = vmatprep.subr.mxu0 %v3709_v17 }
 0x2d7   : > { %3189 = vmatpush3.msra.mxu1 %v2770_v57  ;;  %3262 = vmatpush3.msra.mxu0 %v2800_v6  ;;  %v2810_v6 = vld [vmem:[%s5037_s7 + $0x140] sm:$0xff] }
 0x2d8   : > { %3190 = vmatprep.subr.mxu1 %v3709_v17  ;;  %3263 = vmatprep.subr.mxu0 %v3709_v17 }
 0x2d9   : > { %3191 = vmatpush3.msra.mxu1 %v2769_v58  ;;  %3264 = vmatpush3.msra.mxu0 %v2799_v8  ;;  %v2816_v58 = vld [vmem:[%s5037_s7 + $0x170] sm:$0xff]  ;;  %v2809_v8 = vld [vmem:[%s5037_s7 + $0x138] sm:$0xff] }
 0x2da   : > { %3192 = vmatprep.subr.mxu1 %v3709_v17  ;;  %3265 = vmatprep.subr.mxu0 %v3709_v17 }
 0x2db   : > { %3193 = vmatpush3.msra.mxu1 %v2768_v59  ;;  %3266 = vmatpush3.msra.mxu0 %v2798_v10  ;;  %v2833_v59 = vld [vmem:[%s5037_s7 + $0x1f8] sm:$0xff]  ;;  %v2808_v10 = vld [vmem:[%s5037_s7 + $0x130] sm:$0xff] }
 0x2dc   : > { %3194 = vmatprep.subr.mxu1 %v3709_v17  ;;  %3267 = vmatprep.subr.mxu0 %v3709_v17 }
 0x2dd   : > { %3195 = vmatpush3.msra.mxu1 %v2767_v60  ;;  %3268 = vmatpush3.msra.mxu0 %v2797_v12  ;;  %v2815_v60 = vld [vmem:[%s5037_s7 + $0x168] sm:$0xff] }
 0x2de   : > { %3196 = vmatprep.subr.mxu1 %v3709_v17  ;;  %3269 = vmatprep.subr.mxu0 %v3709_v17  ;;  %v2807_v12 = vld [vmem:[%s5037_s7 + $0x128] sm:$0xff] }
 0x2df   : > { %3197 = vmatpush3.msra.mxu1 %v2766_v61  ;;  %3270 = vmatpush3.msra.mxu0 %v2796_v14  ;;  %v2832_v61 = vld [vmem:[%s5037_s7 + $0x1f0] sm:$0xff]  ;;  %v2806_v14 = vld [vmem:[%s5037_s7 + $0x120] sm:$0xff] }
 0x2e0   : > { %3198 = vmatprep.subr.mxu1 %v3709_v17  ;;  %3271 = vmatprep.subr.mxu0 %v3709_v17 }
 0x2e1   : > { %3199 = vmatpush3.msra.mxu1 %v2765_v63  ;;  %3272 = vmatpush3.msra.mxu0 %v2795_v16  ;;  %v2831_v63 = vld [vmem:[%s5037_s7 + $0x1e8] sm:$0xff]  ;;  %v2805_v16 = vld [vmem:[%s5037_s7 + $0x118] sm:$0xff] }
 0x2e2   : > { %3201 = vmatmul.mubr.msk.f32.vlgmr.msra.gmra.mxu1 %vm1280_vm8, %v1523_v1  ;;  %3224 = vmatprep.subr.mxu1 %v3709_v17  ;;  %v2830_v1 = vld [vmem:[%s5037_s7 + $0x1e0] sm:$0xff] }
 0x2e3   : > { %3256 = vmatprep.mubr.msk.f32.mxu1 %vm3710_vm7, %v3709_v17  ;;  %3225 = vmatpush3.msra.mxu1 %v1713_v2  ;;  %v2812_v2 = vld [vmem:[%s5037_s7 + $0x150] sm:$0xff] }
 0x2e4   : > { %3226 = vmatprep.subr.mxu1 %v3709_v17  ;;  %3273 = vmatprep.subr.mxu0 %v3709_v17 }
 0x2e5   : > { %3227 = vmatpush3.msra.mxu1 %v1712_v3  ;;  %3274 = vmatpush3.msra.mxu0 %v2794_v19  ;;  %v2829_v3 = vld [vmem:[%s5037_s7 + $0x1d8] sm:$0xff]  ;;  %v2804_v19 = vld [vmem:[%s5037_s7 + $0x110] sm:$0xff] }
 0x2e6   : > { %3228 = vmatprep.subr.mxu1 %v3709_v17  ;;  %3275 = vmatprep.subr.mxu0 %v3709_v17 }
 0x2e7   : > { %3229 = vmatpush3.msra.mxu1 %v1711_v5  ;;  %3276 = vmatpush3.msra.mxu0 %v2793_v21  ;;  %v2828_v5 = vld [vmem:[%s5037_s7 + $0x1d0] sm:$0xff]  ;;  %v2803_v21 = vld [vmem:[%s5037_s7 + $0x108] sm:$0xff] }
 0x2e8   : > { %3230 = vmatprep.subr.mxu1 %v3709_v17  ;;  %3277 = vmatprep.subr.mxu0 %v3709_v17 }
 0x2e9   : > { %3231 = vmatpush3.msra.mxu1 %v1710_v7  ;;  %3278 = vmatpush3.msra.mxu0 %v2792_v23  ;;  %v2827_v7 = vld [vmem:[%s5037_s7 + $0x1c8] sm:$0xff]  ;;  %v2802_v23 = vld [vmem:[%s5037_s7 + $0x100] sm:$0xff] }
 0x2ea   : > { %3232 = vmatprep.subr.mxu1 %v3709_v17  ;;  %3279 = vmatprep.subr.mxu0 %v3709_v17 }
 0x2eb   : > { %3233 = vmatpush3.msra.mxu1 %v1709_v9  ;;  %3280 = vmatpush3.msra.mxu0 %v2791_v25  ;;  %v2826_v9 = vld [vmem:[%s5037_s7 + $0x1c0] sm:$0xff] }
 0x2ec   : > { %3234 = vmatprep.subr.mxu1 %v3709_v17  ;;  %3281 = vmatprep.subr.mxu0 %v3709_v17 }
 0x2ed   : > { %3235 = vmatpush3.msra.mxu1 %v1708_v11  ;;  %3282 = vmatpush3.msra.mxu0 %v2790_v27  ;;  %v2825_v11 = vld [vmem:[%s5037_s7 + $0x1b8] sm:$0xff] }
 0x2ee   : > { %3236 = vmatprep.subr.mxu1 %v3709_v17  ;;  %3283 = vmatprep.subr.mxu0 %v3709_v17  ;;  %v2849_v27 = vld [vmem:[%s5037_s7 + $0x278] sm:$0xff] }
 0x2ef   : > { %3237 = vmatpush3.msra.mxu1 %v1707_v13  ;;  %3284 = vmatpush3.msra.mxu0 %v2789_v29  ;;  %v2824_v13 = vld [vmem:[%s5037_s7 + $0x1b0] sm:$0xff] }
 0x2f0   : > { %3238 = vmatprep.subr.mxu1 %v3709_v17  ;;  %3285 = vmatprep.subr.mxu0 %v3709_v17  ;;  %v2848_v29 = vld [vmem:[%s5037_s7 + $0x270] sm:$0xff] }
 0x2f1   : > { %3239 = vmatpush3.msra.mxu1 %v1706_v15  ;;  %3286 = vmatpush3.msra.mxu0 %v2788_v31  ;;  %v2823_v15 = vld [vmem:[%s5037_s7 + $0x1a8] sm:$0xff] }
 0x2f2   : > { %3240 = vmatprep.subr.mxu1 %v3709_v17  ;;  %3287 = vmatprep.subr.mxu0 %v3709_v17  ;;  %v2847_v31 = vld [vmem:[%s5037_s7 + $0x268] sm:$0xff] }
 0x2f3   : > { %3241 = vmatpush3.msra.mxu1 %v1705_v18  ;;  %3288 = vmatpush3.msra.mxu0 %v2787_v33  ;;  %v2822_v18 = vld [vmem:[%s5037_s7 + $0x1a0] sm:$0xff] }
 0x2f4   : > { %3242 = vmatprep.subr.mxu1 %v3709_v17  ;;  %3289 = vmatprep.subr.mxu0 %v3709_v17  ;;  %v2846_v33 = vld [vmem:[%s5037_s7 + $0x260] sm:$0xff] }
 0x2f5   : > { %3243 = vmatpush3.msra.mxu1 %v1704_v20  ;;  %3290 = vmatpush3.msra.mxu0 %v2786_v34  ;;  %v2821_v20 = vld [vmem:[%s5037_s7 + $0x198] sm:$0xff]  ;;  %v2863_v34 = vld [vmem:[%s5037_s7 + $0x2e8] sm:$0xff] }
 0x2f6   : > { %3244 = vmatprep.subr.mxu1 %v3709_v17  ;;  %3329 = vmatprep.subr.mxu0 %v3709_v17 }
 0x2f7   : > { %3245 = vmatpush3.msra.mxu1 %v1703_v22  ;;  %v2820_v22 = vld [vmem:[%s5037_s7 + $0x190] sm:$0xff] }
 0x2f8   : > { %3246 = vmatprep.subr.mxu1 %v3709_v17 }
 0x2f9   : > { %3247 = vmatpush3.msra.mxu1 %v1702_v24  ;;  %v2819_v24 = vld [vmem:[%s5037_s7 + $0x188] sm:$0xff] }
 0x2fa   : > { %3248 = vmatprep.subr.mxu1 %v3709_v17 }
 0x2fb   : > { %3249 = vmatpush3.msra.mxu1 %v1701_v26  ;;  %v2818_v26 = vld [vmem:[%s5037_s7 + $0x180] sm:$0xff] }
 0x2fc   : > { %3250 = vmatprep.subr.mxu1 %v3709_v17 }
 0x2fd   : > { %3251 = vmatpush3.msra.mxu1 %v1700_v28 }
 0x2fe   : > { %3252 = vmatprep.subr.mxu1 %v3709_v17 }
 0x2ff   : > { %3253 = vmatpush3.msra.mxu1 %v1699_v30  ;;  %v2865_v30 = vld [vmem:[%s5037_s7 + $0x2f8] sm:$0xff] }
 0x300   : > { %3254 = vmatprep.subr.mxu1 %v3709_v17 }
 0x301   : > { %3255 = vmatpush3.msra.mxu1 %v1698_v32  ;;  %v2864_v32 = vld [vmem:[%s5037_s7 + $0x2f0] sm:$0xff] }
 0x302   : > { %3294 = vmatprep.subr.mxu1 %v3709_v17 }
 0x37d   : > { %v1349_v35 = vpop.f32.mrf.mxu1  ;;  %v1506_v36 = vpop.f32.mrf.mxu0 }
 0x37f   : > { %v3139_v37 = vpop.f32.mrf.mxu1  ;;  %v3181_v38 = vpop.f32.mrf.mxu0 }
 0x380   : > { %v2844_v37 = vld [vmem:[%s5037_s7 + $0x250] sm:$0xff]  ;;  %v2861_v38 = vld [vmem:[%s5037_s7 + $0x2d8] sm:$0xff] }
 0x390   : > { %v1421_v39 = vpop.f32.mrf.mxu1 }
 0x391   : > { %v1678_v40 = vpop.f32.mrf.mxu0  ;;  %v1422_v43 = vadd.f32 %v1421_v39, %v1349_v35  ;;  %v2845_v35 = vld [vmem:[%s5037_s7 + $0x258] sm:$0xff]  ;;  %v2843_v39 = vld [vmem:[%s5037_s7 + $0x248] sm:$0xff] }
 0x392   : > { %v3160_v41 = vpop.f32.mrf.mxu1 }
 0x393   : > { %v3223_v42 = vpop.f32.mrf.mxu0  ;;  %v1510_v44 = vadd.f32 %v1506_v36, %v1422_v43  ;;  %v2862_v36 = vld [vmem:[%s5037_s7 + $0x2e0] sm:$0xff]  ;;  %v2841_v43 = vld [vmem:[%s5037_s7 + $0x238] sm:$0xff] }
 0x394   : > { %v2842_v41 = vld [vmem:[%s5037_s7 + $0x240] sm:$0xff]  ;;  %v2859_v42 = vld [vmem:[%s5037_s7 + $0x2c8] sm:$0xff] }
 0x3a2   : > { %v1592_v45 = vpop.f32.mrf.mxu1 }
 0x3a3   : > { %v1596_v46 = vadd.f32 %v1592_v45, %v1510_v44  ;;  %v2858_v44 = vld [vmem:[%s5037_s7 + $0x2c0] sm:$0xff]  ;;  %v2840_v45 = vld [vmem:[%s5037_s7 + $0x230] sm:$0xff] }
 0x3a4   : > { %v3202_v48 = vpop.f32.mrf.mxu1 }
 0x3a5   : > { %v1682_v49 = vadd.f32 %v1678_v40, %v1596_v46  ;;  %v2860_v40 = vld [vmem:[%s5037_s7 + $0x2d0] sm:$0xff]  ;;  %v2857_v46 = vld [vmem:[%s5037_s7 + $0x2b8] sm:$0xff] }
 0x3a6   : > { %v2856_v48 = vld [vmem:[%s5037_s7 + $0x2b0] sm:$0xff] }
 0x3a7   : > { %v1690_v50 = vadd.f32 %v2785_v47, %v1682_v49  ;;  %v2839_v47 = vld [vmem:[%s5037_s7 + $0x228] sm:$0xff]  ;;  %v2838_v49 = vld [vmem:[%s5037_s7 + $0x220] sm:$0xff] }
 0x3a9   : > { %v1691_v51 = vsub.f32 0.0, %v1690_v50  ;;  %v2855_v50 = vld [vmem:[%s5037_s7 + $0x2a8] sm:$0xff] }
 0x3ab   : > { %v1692_v52 = vmul.f32 1.442695, %v1691_v51  ;;  %v2837_v51 = vld [vmem:[%s5037_s7 + $0x218] sm:$0xff] }
 0x3ad   : > { %3635 = vpow2.f32 %v1692_v52  ;;  %v2854_v52 = vld [vmem:[%s5037_s7 + $0x2a0] sm:$0xff] }
 0x3ba   : > { %v3636_v53 = vpop.eup %3635 }
 0x3bb   : > { %v1694_v54 = vadd.f32 1.0, %v3636_v53  ;;  %v2836_v53 = vld [vmem:[%s5037_s7 + $0x210] sm:$0xff] }
 0x3bd   : > { %3637 = vrcp.f32 %v1694_v54  ;;  %v2853_v54 = vld [vmem:[%s5037_s7 + $0x298] sm:$0xff] }
 0x3ca   : > { %v4471_v56 = vpop.eup %3637 }
 0x3cb   : > { %3257 = vmatmul.mubr.f32.vlgmr.msra.gmra.mxu1 %v4471_v56  ;;  %v1803_v57 = vrot.slane %v4471_v56, 1  ;;  %v1893_v25 = vrot.slane %v4471_v56, 2  ;;  %v1983_v28 = vrot.slane %v4471_v56, 3 }
 0x3cc   : > { %3295 = vmatpush3.msra.mxu1 %v2817_v55  ;;  %3326 = vmatprep.mubr.msk.f32.mxu1 %vm3710_vm7, %v3709_v17  ;;  %v2835_v55 = vld [vmem:[%s5037_s7 + $0x208] sm:$0xff] }
 0x3cd   : > { %3296 = vmatprep.subr.mxu1 %v3709_v17  ;;  %3292 = vmatmul.mubr.f32.vlgmr.msra.gmra.mxu0 %v1803_v57  ;;  %v2852_v57 = vld [vmem:[%s5037_s7 + $0x290] sm:$0xff] }
 0x3ce   : > { %3297 = vmatpush3.msra.mxu1 %v2816_v58  ;;  %3330 = vmatpush3.msra.mxu0 %v2833_v59  ;;  %v2834_v58 = vld [vmem:[%s5037_s7 + $0x200] sm:$0xff]  ;;  %v2851_v59 = vld [vmem:[%s5037_s7 + $0x288] sm:$0xff] }
 0x3cf   : > { %3298 = vmatprep.subr.mxu1 %v3709_v17  ;;  %3331 = vmatprep.subr.mxu0 %v3709_v17 }
 0x3d0   : > { %3299 = vmatpush3.msra.mxu1 %v2815_v60  ;;  %3332 = vmatpush3.msra.mxu0 %v2832_v61  ;;  %v2073_v60 = vrot.slane %v4471_v56, 4  ;;  %v2850_v61 = vld [vmem:[%s5037_s7 + $0x280] sm:$0xff] }
 0x3d1   : > { %3300 = vmatprep.subr.mxu1 %v3709_v17  ;;  %3333 = vmatprep.subr.mxu0 %v3709_v17 }
 0x3d2   : > { %3301 = vmatpush3.msra.mxu1 %v2814_v62  ;;  %3334 = vmatpush3.msra.mxu0 %v2831_v63  ;;  %v2881_v62 = vld [vmem:[%s5037_s7 + $0x378] sm:$0xff]  ;;  %v2163_v63 = vrot.slane %v4471_v56, 5 }
 0x3d3   : > { %3302 = vmatprep.subr.mxu1 %v3709_v17  ;;  %3335 = vmatprep.subr.mxu0 %v3709_v17 }
 0x3d4   : > { %3303 = vmatpush3.msra.mxu1 %v2813_v0  ;;  %3336 = vmatpush3.msra.mxu0 %v2830_v1  ;;  %v2880_v0 = vld [vmem:[%s5037_s7 + $0x370] sm:$0xff]  ;;  %v2897_v1 = vld [vmem:[%s5037_s7 + $0x3f8] sm:$0xff] }
 0x3d5   : > { %3304 = vmatprep.subr.mxu1 %v3709_v17  ;;  %3337 = vmatprep.subr.mxu0 %v3709_v17 }
 0x3d6   : > { %3305 = vmatpush3.msra.mxu1 %v2812_v2  ;;  %3338 = vmatpush3.msra.mxu0 %v2829_v3  ;;  %v2879_v2 = vld [vmem:[%s5037_s7 + $0x368] sm:$0xff]  ;;  %v2896_v3 = vld [vmem:[%s5037_s7 + $0x3f0] sm:$0xff] }
 0x3d7   : > { %3306 = vmatprep.subr.mxu1 %v3709_v17  ;;  %3339 = vmatprep.subr.mxu0 %v3709_v17 }
 0x3d8   : > { %3307 = vmatpush3.msra.mxu1 %v2811_v4  ;;  %3340 = vmatpush3.msra.mxu0 %v2828_v5  ;;  %v2878_v4 = vld [vmem:[%s5037_s7 + $0x360] sm:$0xff]  ;;  %v2895_v5 = vld [vmem:[%s5037_s7 + $0x3e8] sm:$0xff] }
 0x3d9   : > { %3308 = vmatprep.subr.mxu1 %v3709_v17  ;;  %3341 = vmatprep.subr.mxu0 %v3709_v17 }
 0x3da   : > { %3309 = vmatpush3.msra.mxu1 %v2810_v6  ;;  %3342 = vmatpush3.msra.mxu0 %v2827_v7  ;;  %v2877_v6 = vld [vmem:[%s5037_s7 + $0x358] sm:$0xff]  ;;  %v2894_v7 = vld [vmem:[%s5037_s7 + $0x3e0] sm:$0xff] }
 0x3db   : > { %3310 = vmatprep.subr.mxu1 %v3709_v17  ;;  %3343 = vmatprep.subr.mxu0 %v3709_v17 }
 0x3dc   : > { %3311 = vmatpush3.msra.mxu1 %v2809_v8  ;;  %3344 = vmatpush3.msra.mxu0 %v2826_v9  ;;  %v2876_v8 = vld [vmem:[%s5037_s7 + $0x350] sm:$0xff]  ;;  %v2893_v9 = vld [vmem:[%s5037_s7 + $0x3d8] sm:$0xff] }
 0x3dd   : > { %3312 = vmatprep.subr.mxu1 %v3709_v17  ;;  %3345 = vmatprep.subr.mxu0 %v3709_v17 }
 0x3de   : > { %3313 = vmatpush3.msra.mxu1 %v2808_v10  ;;  %3346 = vmatpush3.msra.mxu0 %v2825_v11  ;;  %v2875_v10 = vld [vmem:[%s5037_s7 + $0x348] sm:$0xff]  ;;  %v2892_v11 = vld [vmem:[%s5037_s7 + $0x3d0] sm:$0xff] }
 0x3df   : > { %3314 = vmatprep.subr.mxu1 %v3709_v17  ;;  %3347 = vmatprep.subr.mxu0 %v3709_v17 }
 0x3e0   : > { %3315 = vmatpush3.msra.mxu1 %v2807_v12  ;;  %3348 = vmatpush3.msra.mxu0 %v2824_v13  ;;  %v2874_v12 = vld [vmem:[%s5037_s7 + $0x340] sm:$0xff]  ;;  %v2891_v13 = vld [vmem:[%s5037_s7 + $0x3c8] sm:$0xff] }
 0x3e1   : > { %3316 = vmatprep.subr.mxu1 %v3709_v17  ;;  %3349 = vmatprep.subr.mxu0 %v3709_v17 }
 0x3e2   : > { %3317 = vmatpush3.msra.mxu1 %v2806_v14  ;;  %3350 = vmatpush3.msra.mxu0 %v2823_v15  ;;  %v2873_v14 = vld [vmem:[%s5037_s7 + $0x338] sm:$0xff]  ;;  %v2890_v15 = vld [vmem:[%s5037_s7 + $0x3c0] sm:$0xff] }
 0x3e3   : > { %3318 = vmatprep.subr.mxu1 %v3709_v17  ;;  %3351 = vmatprep.subr.mxu0 %v3709_v17 }
 0x3e4   : > { %3319 = vmatpush3.msra.mxu1 %v2805_v16  ;;  %3352 = vmatpush3.msra.mxu0 %v2822_v18  ;;  %v2872_v16 = vld [vmem:[%s5037_s7 + $0x330] sm:$0xff]  ;;  %v2889_v18 = vld [vmem:[%s5037_s7 + $0x3b8] sm:$0xff] }
 0x3e5   : > { %3320 = vmatprep.subr.mxu1 %v3709_v17  ;;  %3353 = vmatprep.subr.mxu0 %v3709_v17 }
 0x3e6   : > { %3321 = vmatpush3.msra.mxu1 %v2804_v19  ;;  %3354 = vmatpush3.msra.mxu0 %v2821_v20  ;;  %v2871_v19 = vld [vmem:[%s5037_s7 + $0x328] sm:$0xff]  ;;  %v2888_v20 = vld [vmem:[%s5037_s7 + $0x3b0] sm:$0xff] }
 0x3e7   : > { %3322 = vmatprep.subr.mxu1 %v3709_v17  ;;  %3355 = vmatprep.subr.mxu0 %v3709_v17 }
 0x3e8   : > { %3323 = vmatpush3.msra.mxu1 %v2803_v21  ;;  %3356 = vmatpush3.msra.mxu0 %v2820_v22  ;;  %v2870_v21 = vld [vmem:[%s5037_s7 + $0x320] sm:$0xff]  ;;  %v2887_v22 = vld [vmem:[%s5037_s7 + $0x3a8] sm:$0xff] }
 0x3e9   : > { %3324 = vmatprep.subr.mxu1 %v3709_v17  ;;  %3357 = vmatprep.subr.mxu0 %v3709_v17 }
 0x3ea   : > { %3325 = vmatpush3.msra.mxu1 %v2802_v23  ;;  %3358 = vmatpush3.msra.mxu0 %v2819_v24  ;;  %v2869_v23 = vld [vmem:[%s5037_s7 + $0x318] sm:$0xff]  ;;  %v2886_v24 = vld [vmem:[%s5037_s7 + $0x3a0] sm:$0xff] }
 0x3eb   : > { %3327 = vmatmul.mubr.f32.vlgmr.msra.gmra.mxu1 %v1893_v25  ;;  %3359 = vmatprep.subr.mxu0 %v3709_v17  ;;  %v2868_v25 = vld [vmem:[%s5037_s7 + $0x310] sm:$0xff] }
 0x3ec   : > { %3364 = vmatprep.subr.mxu1 %v3709_v17  ;;  %3360 = vmatpush3.msra.mxu0 %v2818_v26  ;;  %v2885_v26 = vld [vmem:[%s5037_s7 + $0x398] sm:$0xff] }
 0x3ed   : > { %3361 = vmatprep.mubr.msk.f32.mxu0 %vm3710_vm7, %v3709_v17  ;;  %3365 = vmatpush3.msra.mxu1 %v2849_v27  ;;  %v2867_v27 = vld [vmem:[%s5037_s7 + $0x308] sm:$0xff] }
 0x3ee   : > { %3362 = vmatmul.mubr.f32.vlgmr.msra.gmra.mxu0 %v1983_v28  ;;  %3366 = vmatprep.subr.mxu1 %v3709_v17  ;;  %v2884_v28 = vld [vmem:[%s5037_s7 + $0x390] sm:$0xff] }
 0x3ef   : > { %3399 = vmatprep.subr.mxu0 %v3709_v17  ;;  %3367 = vmatpush3.msra.mxu1 %v2848_v29  ;;  %v2866_v29 = vld [vmem:[%s5037_s7 + $0x300] sm:$0xff] }
 0x3f0   : > { %3400 = vmatpush3.msra.mxu0 %v2865_v30  ;;  %3368 = vmatprep.subr.mxu1 %v3709_v17  ;;  %v2883_v30 = vld [vmem:[%s5037_s7 + $0x388] sm:$0xff] }
 0x3f1   : > { %3401 = vmatprep.subr.mxu0 %v3709_v17  ;;  %3369 = vmatpush3.msra.mxu1 %v2847_v31  ;;  %v2253_v31 = vrot.slane %v4471_v56, 6 }
 0x3f2   : > { %3402 = vmatpush3.msra.mxu0 %v2864_v32  ;;  %3370 = vmatprep.subr.mxu1 %v3709_v17  ;;  %v2882_v32 = vld [vmem:[%s5037_s7 + $0x380] sm:$0xff] }
 0x3f3   : > { %3403 = vmatprep.subr.mxu0 %v3709_v17  ;;  %3371 = vmatpush3.msra.mxu1 %v2846_v33  ;;  %v2343_v33 = vrot.slane %v4471_v56, 7  ;;  %v2435_v56 = vld [vmem:[%s5039_s9 + $0x68] sm:$0xff] }
 0x3f4   : > { %3404 = vmatpush3.msra.mxu0 %v2863_v34  ;;  %3372 = vmatprep.subr.mxu1 %v3709_v17  ;;  %v2436_v34 = vld [vmem:[%s5039_s9 + $0x70] sm:$0xff] }
 0x3f5   : > { %3405 = vmatprep.subr.mxu0 %v3709_v17  ;;  %3373 = vmatpush3.msra.mxu1 %v2845_v35  ;;  %v2434_v35 = vld [vmem:[%s5039_s9 + $0x60] sm:$0xff] }
 0x3f6   : > { %3406 = vmatpush3.msra.mxu0 %v2862_v36  ;;  %3374 = vmatprep.subr.mxu1 %v3709_v17  ;;  %v2433_v36 = vld [vmem:[%s5039_s9 + $0x58] sm:$0xff] }
 0x3f7   : > { %3407 = vmatprep.subr.mxu0 %v3709_v17  ;;  %3375 = vmatpush3.msra.mxu1 %v2844_v37  ;;  %v2432_v37 = vld [vmem:[%s5039_s9 + $0x50] sm:$0xff] }
 0x3f8   : > { %3408 = vmatpush3.msra.mxu0 %v2861_v38  ;;  %3376 = vmatprep.subr.mxu1 %v3709_v17  ;;  %v2431_v38 = vld [vmem:[%s5039_s9 + $0x48] sm:$0xff] }
 0x3f9   : > { %3409 = vmatprep.subr.mxu0 %v3709_v17  ;;  %3377 = vmatpush3.msra.mxu1 %v2843_v39  ;;  %v2430_v39 = vld [vmem:[%s5039_s9 + $0x40] sm:$0xff] }
 0x3fa   : > { %3410 = vmatpush3.msra.mxu0 %v2860_v40  ;;  %3378 = vmatprep.subr.mxu1 %v3709_v17  ;;  %v2429_v40 = vld [vmem:[%s5039_s9 + $0x38] sm:$0xff] }
 0x3fb   : > { %3411 = vmatprep.subr.mxu0 %v3709_v17  ;;  %3379 = vmatpush3.msra.mxu1 %v2842_v41  ;;  %v2428_v41 = vld [vmem:[%s5039_s9 + $0x30] sm:$0xff] }
 0x3fc   : > { %3412 = vmatpush3.msra.mxu0 %v2859_v42  ;;  %3380 = vmatprep.subr.mxu1 %v3709_v17  ;;  %v2427_v42 = vld [vmem:[%s5039_s9 + $0x28] sm:$0xff] }
 0x3fd   : > { %3413 = vmatprep.subr.mxu0 %v3709_v17  ;;  %3381 = vmatpush3.msra.mxu1 %v2841_v43  ;;  %v1697_v43 = vld [vmem:[%s5038_s8] sm:$0x1] }
 0x3fe   : > { %3414 = vmatpush3.msra.mxu0 %v2858_v44  ;;  %3382 = vmatprep.subr.mxu1 %v3709_v17  ;;  %v2426_v44 = vld [vmem:[%s5039_s9 + $0x20] sm:$0xff] }
 0x3ff   : > { %3415 = vmatprep.subr.mxu0 %v3709_v17  ;;  %3383 = vmatpush3.msra.mxu1 %v2840_v45 }
 0x400   : > { %3416 = vmatpush3.msra.mxu0 %v2857_v46  ;;  %3384 = vmatprep.subr.mxu1 %v3709_v17 }
 0x401   : > { %3417 = vmatprep.subr.mxu0 %v3709_v17  ;;  %3385 = vmatpush3.msra.mxu1 %v2839_v47  ;;  %v2425_v47 = vld [vmem:[%s5039_s9 + $0x18] sm:$0xff] }
 0x402   : > { %3418 = vmatpush3.msra.mxu0 %v2856_v48  ;;  %3386 = vmatprep.subr.mxu1 %v3709_v17 }
 0x403   : > { %3419 = vmatprep.subr.mxu0 %v3709_v17  ;;  %3387 = vmatpush3.msra.mxu1 %v2838_v49 }
 0x404   : > { %3420 = vmatpush3.msra.mxu0 %v2855_v50  ;;  %3388 = vmatprep.subr.mxu1 %v3709_v17 }
 0x405   : > { %3421 = vmatprep.subr.mxu0 %v3709_v17  ;;  %3389 = vmatpush3.msra.mxu1 %v2837_v51  ;;  %v2424_v51 = vld [vmem:[%s5039_s9 + $0x10] sm:$0xff] }
 0x406   : > { %3422 = vmatpush3.msra.mxu0 %v2854_v52  ;;  %3390 = vmatprep.subr.mxu1 %v3709_v17 }
 0x407   : > { %3423 = vmatprep.subr.mxu0 %v3709_v17  ;;  %3391 = vmatpush3.msra.mxu1 %v2836_v53  ;;  %v2423_v53 = vld [vmem:[%s5039_s9 + $0x8] sm:$0xff] }
 0x408   : > { %3424 = vmatpush3.msra.mxu0 %v2853_v54  ;;  %3392 = vmatprep.subr.mxu1 %v3709_v17  ;;  %v2422_v54 = vld [vmem:[%s5039_s9] sm:$0xff] }
 0x409   : > { %3425 = vmatprep.subr.mxu0 %v3709_v17  ;;  %3393 = vmatpush3.msra.mxu1 %v2835_v55 }
 0x40a   : > { %3426 = vmatpush3.msra.mxu0 %v2852_v57  ;;  %3394 = vmatprep.subr.mxu1 %v3709_v17 }
 0x40b   : > { %3427 = vmatprep.subr.mxu0 %v3709_v17  ;;  %3395 = vmatpush3.msra.mxu1 %v2834_v58 }
 0x40c   : > { %3396 = vmatprep.mubr.msk.f32.mxu1 %vm3710_vm7, %v3709_v17  ;;  %3428 = vmatpush3.msra.mxu0 %v2851_v59 }
 0x40d   : > { %3397 = vmatmul.mubr.f32.vlgmr.msra.gmra.mxu1 %v2073_v60  ;;  %3429 = vmatprep.subr.mxu0 %v3709_v17 }
 0x40e   : > { %3434 = vmatprep.subr.mxu1 %v3709_v17  ;;  %3430 = vmatpush3.msra.mxu0 %v2850_v61 }
 0x40f   : > { %3431 = vmatprep.mubr.msk.f32.mxu0 %vm3710_vm7, %v3709_v17  ;;  %3435 = vmatpush3.msra.mxu1 %v2881_v62 }
 0x410   : > { %3432 = vmatmul.mubr.f32.vlgmr.msra.gmra.mxu0 %v2163_v63  ;;  %3436 = vmatprep.subr.mxu1 %v3709_v17 }
 0x411   : > { %3469 = vmatprep.subr.mxu0 %v3709_v17  ;;  %3437 = vmatpush3.msra.mxu1 %v2880_v0 }
 0x412   : > { %3470 = vmatpush3.msra.mxu0 %v2897_v1  ;;  %3438 = vmatprep.subr.mxu1 %v3709_v17 }
 0x413   : > { %3471 = vmatprep.subr.mxu0 %v3709_v17  ;;  %3439 = vmatpush3.msra.mxu1 %v2879_v2 }
 0x414   : > { %3472 = vmatpush3.msra.mxu0 %v2896_v3  ;;  %3440 = vmatprep.subr.mxu1 %v3709_v17 }
 0x415   : > { %3473 = vmatprep.subr.mxu0 %v3709_v17  ;;  %3441 = vmatpush3.msra.mxu1 %v2878_v4 }
 0x416   : > { %3474 = vmatpush3.msra.mxu0 %v2895_v5  ;;  %3442 = vmatprep.subr.mxu1 %v3709_v17 }
 0x417   : > { %3475 = vmatprep.subr.mxu0 %v3709_v17  ;;  %3443 = vmatpush3.msra.mxu1 %v2877_v6 }
 0x418   : > { %3476 = vmatpush3.msra.mxu0 %v2894_v7  ;;  %3444 = vmatprep.subr.mxu1 %v3709_v17 }
 0x419   : > { %3477 = vmatprep.subr.mxu0 %v3709_v17  ;;  %3445 = vmatpush3.msra.mxu1 %v2876_v8 }
 0x41a   : > { %3478 = vmatpush3.msra.mxu0 %v2893_v9  ;;  %3446 = vmatprep.subr.mxu1 %v3709_v17 }
 0x41b   : > { %3479 = vmatprep.subr.mxu0 %v3709_v17  ;;  %3447 = vmatpush3.msra.mxu1 %v2875_v10 }
 0x41c   : > { %3480 = vmatpush3.msra.mxu0 %v2892_v11  ;;  %3448 = vmatprep.subr.mxu1 %v3709_v17 }
 0x41d   : > { %3481 = vmatprep.subr.mxu0 %v3709_v17  ;;  %3449 = vmatpush3.msra.mxu1 %v2874_v12 }
 0x41e   : > { %3482 = vmatpush3.msra.mxu0 %v2891_v13  ;;  %3450 = vmatprep.subr.mxu1 %v3709_v17 }
 0x41f   : > { %3483 = vmatprep.subr.mxu0 %v3709_v17  ;;  %3451 = vmatpush3.msra.mxu1 %v2873_v14 }
 0x420   : > { %3484 = vmatpush3.msra.mxu0 %v2890_v15  ;;  %3452 = vmatprep.subr.mxu1 %v3709_v17  ;;  %v2528_v15 = vld [vmem:[%s5041_s11 + $0x50] sm:$0xf] }
 0x421   : > { %3485 = vmatprep.subr.mxu0 %v3709_v17  ;;  %3453 = vmatpush3.msra.mxu1 %v2872_v16  ;;  %v2527_v16 = vld [vmem:[%s5041_s11 + $0x48] sm:$0xff] }
 0x422   : > { %3486 = vmatpush3.msra.mxu0 %v2889_v18  ;;  %3454 = vmatprep.subr.mxu1 %v3709_v17  ;;  %v2526_v18 = vld [vmem:[%s5041_s11 + $0x40] sm:$0xff] }
 0x423   : > { %3487 = vmatprep.subr.mxu0 %v3709_v17  ;;  %3455 = vmatpush3.msra.mxu1 %v2871_v19  ;;  %v2525_v19 = vld [vmem:[%s5041_s11 + $0x38] sm:$0xff] }
 0x424   : > { %3488 = vmatpush3.msra.mxu0 %v2888_v20  ;;  %3456 = vmatprep.subr.mxu1 %v3709_v17  ;;  %v2524_v20 = vld [vmem:[%s5041_s11 + $0x30] sm:$0xff] }
 0x425   : > { %3489 = vmatprep.subr.mxu0 %v3709_v17  ;;  %3457 = vmatpush3.msra.mxu1 %v2870_v21  ;;  %v2523_v21 = vld [vmem:[%s5041_s11 + $0x28] sm:$0xff] }
 0x426   : > { %3490 = vmatpush3.msra.mxu0 %v2887_v22  ;;  %3458 = vmatprep.subr.mxu1 %v3709_v17  ;;  %v2522_v22 = vld [vmem:[%s5041_s11 + $0x20] sm:$0xff] }
 0x427   : > { %3491 = vmatprep.subr.mxu0 %v3709_v17  ;;  %3459 = vmatpush3.msra.mxu1 %v2869_v23  ;;  %v2521_v23 = vld [vmem:[%s5041_s11 + $0x18] sm:$0xff] }
 0x428   : > { %3492 = vmatpush3.msra.mxu0 %v2886_v24  ;;  %3460 = vmatprep.subr.mxu1 %v3709_v17  ;;  %v2520_v24 = vld [vmem:[%s5041_s11 + $0x10] sm:$0xff] }
 0x429   : > { %3493 = vmatprep.subr.mxu0 %v3709_v17  ;;  %3461 = vmatpush3.msra.mxu1 %v2868_v25  ;;  %v2519_v25 = vld [vmem:[%s5041_s11 + $0x8] sm:$0xff] }
 0x42a   : > { %3494 = vmatpush3.msra.mxu0 %v2885_v26  ;;  %3462 = vmatprep.subr.mxu1 %v3709_v17  ;;  %v2518_v26 = vld [vmem:[%s5041_s11] sm:$0xff] }
 0x42b   : > { %3495 = vmatprep.subr.mxu0 %v3709_v17  ;;  %3463 = vmatpush3.msra.mxu1 %v2867_v27  ;;  %v2437_v27 = vld [vmem:[%s5040_s10] sm:$0x1] }
 0x42c   : > { %3496 = vmatpush3.msra.mxu0 %v2884_v28  ;;  %3464 = vmatprep.subr.mxu1 %v3709_v17 }
 0x42d   : > { %3497 = vmatprep.subr.mxu0 %v3709_v17  ;;  %3465 = vmatpush3.msra.mxu1 %v2866_v29 }
 0x42e   : > { %3466 = vmatprep.mubr.msk.f32.mxu1 %vm3710_vm7, %v3709_v17  ;;  %3498 = vmatpush3.msra.mxu0 %v2883_v30 }
 0x42f   : > { %3467 = vmatmul.mubr.f32.vlgmr.msra.gmra.mxu1 %v2253_v31  ;;  %3499 = vmatprep.subr.mxu0 %v3709_v17 }
 0x430   : > { %3500 = vmatpush3.msra.mxu0 %v2882_v32  ;;  %3501 = vmatprep.mubr.msk.f32.mxu0 %vm3710_vm7, %v3709_v17 }
 0x431   : > { %3502 = vmatmul.mubr.f32.vlgmr.msra.gmra.mxu0 %v2343_v33  ;;  %3504 = vmatprep.subr.mxu1 %v3709_v17 }
 0x432   : > { %3534 = vmatprep.mubr.msk.f32.mxu1 %vm3710_vm7, %v3709_v17  ;;  %3537 = vmatprep.subr.mxu0 %v3709_v17 }
 0x433   : > { %3559 = vmatprep.mubr.msk.f32.mxu0 %vm3710_vm7, %v3709_v17  ;;  %3505 = vmatpush3.msra.mxu1 %v2436_v34 }
 0x434   : > { %3506 = vmatprep.subr.mxu1 %v3709_v17  ;;  %3538 = vmatpush3.msk.msra.mxu0 %vm478_vm0, %v2528_v15 }
 0x435   : > { %3507 = vmatpush3.msra.mxu1 %v2435_v56  ;;  %3539 = vmatprep.subr.mxu0 %v3709_v17 }
 0x436   : > { %3508 = vmatprep.subr.mxu1 %v3709_v17  ;;  %3540 = vmatpush3.msra.mxu0 %v2527_v16 }
 0x437   : > { %3509 = vmatpush3.msra.mxu1 %v2434_v35  ;;  %3541 = vmatprep.subr.mxu0 %v3709_v17 }
 0x438   : > { %3510 = vmatprep.subr.mxu1 %v3709_v17  ;;  %3542 = vmatpush3.msra.mxu0 %v2526_v18 }
 0x439   : > { %3511 = vmatpush3.msra.mxu1 %v2433_v36  ;;  %3543 = vmatprep.subr.mxu0 %v3709_v17 }
 0x43a   : > { %3512 = vmatprep.subr.mxu1 %v3709_v17  ;;  %3544 = vmatpush3.msra.mxu0 %v2525_v19 }
 0x43b   : > { %3513 = vmatpush3.msra.mxu1 %v2432_v37  ;;  %3545 = vmatprep.subr.mxu0 %v3709_v17 }
 0x43c   : > { %3514 = vmatprep.subr.mxu1 %v3709_v17  ;;  %3546 = vmatpush3.msra.mxu0 %v2524_v20 }
 0x43d   : > { %3515 = vmatpush3.msra.mxu1 %v2431_v38  ;;  %3547 = vmatprep.subr.mxu0 %v3709_v17 }
 0x43e   : > { %3516 = vmatprep.subr.mxu1 %v3709_v17  ;;  %3548 = vmatpush3.msra.mxu0 %v2523_v21 }
 0x43f   : > { %3517 = vmatpush3.msra.mxu1 %v2430_v39  ;;  %3549 = vmatprep.subr.mxu0 %v3709_v17 }
 0x440   : > { %3518 = vmatprep.subr.mxu1 %v3709_v17  ;;  %3550 = vmatpush3.msra.mxu0 %v2522_v22 }
 0x441   : > { %3519 = vmatpush3.msra.mxu1 %v2429_v40  ;;  %3551 = vmatprep.subr.mxu0 %v3709_v17 }
 0x442   : > { %3520 = vmatprep.subr.mxu1 %v3709_v17  ;;  %3552 = vmatpush3.msra.mxu0 %v2521_v23 }
 0x443   : > { %3521 = vmatpush3.msra.mxu1 %v2428_v41  ;;  %3553 = vmatprep.subr.mxu0 %v3709_v17 }
 0x444   : > { %3522 = vmatprep.subr.mxu1 %v3709_v17  ;;  %3554 = vmatpush3.msra.mxu0 %v2520_v24 }
 0x445   : > { %3523 = vmatpush3.msra.mxu1 %v2427_v42  ;;  %3555 = vmatprep.subr.mxu0 %v3709_v17 }
 0x446   : > { %3524 = vmatprep.subr.mxu1 %v3709_v17  ;;  %3556 = vmatpush3.msra.mxu0 %v2519_v25 }
 0x447   : > { %3525 = vmatpush3.msra.mxu1 %v2426_v44  ;;  %3557 = vmatprep.subr.mxu0 %v3709_v17 }
 0x448   : > { %3526 = vmatprep.subr.mxu1 %v3709_v17  ;;  %3558 = vmatpush3.msra.mxu0 %v2518_v26 }
 0x449   : > { %3527 = vmatpush3.msra.mxu1 %v2425_v47 }
 0x44a   : > { %3528 = vmatprep.subr.mxu1 %v3709_v17 }
 0x44b   : > { %3529 = vmatpush3.msra.mxu1 %v2424_v51 }
 0x44c   : > { %3530 = vmatprep.subr.mxu1 %v3709_v17 }
 0x44d   : > { %3531 = vmatpush3.msra.mxu1 %v2423_v53 }
 0x44e   : > { %3532 = vmatprep.subr.mxu1 %v3709_v17  ;;  %v2529_v17 = vld [vmem:[%s5042_s12] sm:$0x1] }
 0x44f   : > { %3533 = vmatpush3.msra.mxu1 %v2422_v54 }
 0x48b   : > { %v1780_v45 = vpop.f32.mrf.mxu1 }
 0x48c   : > { %v1784_v46 = vadd.f32 %v1780_v45, %v1697_v43 }
 0x48d   : > { %v3258_v48 = vpop.f32.mrf.mxu1  ;;  %v1871_v49 = vpop.f32.mrf.mxu0 }
 0x48e   : > { %v1875_v50 = vadd.f32 %v1871_v49, %v1784_v46 }
 0x48f   : > { %v3293_v52 = vpop.f32.mrf.mxu0 }
 0x4ab   : > { %v1961_v55 = vpop.f32.mrf.mxu1 }
 0x4ac   : > { %v1965_v0 = vadd.f32 %v1961_v55, %v1875_v50 }
 0x4ad   : > { %v3328_v57 = vpop.f32.mrf.mxu1 }
 0x4ae   : > { %v2051_v58 = vpop.f32.mrf.mxu0 }
 0x4af   : > { %v2055_v1 = vadd.f32 %v2051_v58, %v1965_v0 }
 0x4b0   : > { %v3363_v59 = vpop.f32.mrf.mxu0 }
 0x4cd   : > { %v2141_v60 = vpop.f32.mrf.mxu1 }
 0x4ce   : > { %v2145_v2 = vadd.f32 %v2141_v60, %v2055_v1 }
 0x4cf   : > { %v3398_v61 = vpop.f32.mrf.mxu1 }
 0x4d0   : > { %v2231_v62 = vpop.f32.mrf.mxu0 }
 0x4d1   : > { %v2235_v3 = vadd.f32 %v2231_v62, %v2145_v2 }
 0x4d2   : > { %v3433_v63 = vpop.f32.mrf.mxu0 }
 0x4ef   : > { %v2321_v4 = vpop.f32.mrf.mxu1 }
 0x4f0   : > { %v2325_v5 = vadd.f32 %v2321_v4, %v2235_v3 }
 0x4f1   : > { %v3468_v6 = vpop.f32.mrf.mxu1  ;;  %v2411_v7 = vpop.f32.mrf.mxu0 }
 0x4f2   : > { %v2415_v8 = vadd.f32 %v2411_v7, %v2325_v5 }
 0x4f3   : > { %v3503_v9 = vpop.f32.mrf.mxu0 }
 0x4f4   : > { %v2416_v10 = vsub.f32 0.0, %v2415_v8 }
 0x4f6   : > { %v2417_v11 = vmul.f32 1.442695, %v2416_v10 }
 0x4f8   : > { %3639 = vpow2.f32 %v2417_v11 }
 0x505   : > { %v3640_v12 = vpop.eup %3639 }
 0x506   : > { %v2419_v13 = vadd.f32 1.0, %v3640_v12 }
 0x508   : > { %3641 = vrcp.f32 %v2419_v13 }
 0x515   : > { %v3642_v14 = vpop.eup %3641 }
 0x516   : > { %3535 = vmatmul.mubr.msk.f32.vlgmr.msra.gmra.mxu1 %vm2438_vm9, %v3642_v14 }
 0x5d6   : > { %v2508_v28 = vpop.f32.mrf.mxu1 }
 0x5d7   : > { %v2509_v29 = vadd.f32 %v2508_v28, %v2437_v27 }
 0x5d8   : > { %v3536_v30 = vpop.f32.mrf.mxu1 }
 0x5d9   : > { %v2512_v31 = vsub.f32 0.0, %v2509_v29 }
 0x5db   : > { %v2513_v32 = vmul.f32 1.442695, %v2512_v31 }
 0x5dd   : > { %3643 = vpow2.f32 %v2513_v32 }
 0x5ea   : > { %v3644_v33 = vpop.eup %3643 }
 0x5eb   : > { %v2515_v34 = vadd.f32 1.0, %v3644_v33 }
 0x5ed   : > { %3645 = vrcp.f32 %v2515_v34 }
 0x5fa   : > { %v3646_v56 = vpop.eup %3645 }
 0x5fb   : > { %3560 = vmatmul.mubr.msk.f32.vlgmr.msra.gmra.mxu0 %vm2530_vm10, %v3646_v56 }
 0x6bb   : > { %v2603_v35 = vpop.f32.mrf.mxu0 }
 0x6bc   : > { %v2604_v36 = vadd.f32 %v2603_v35, %v2529_v17 }
 0x6bd   : > { %v3561_v37 = vpop.f32.mrf.mxu0 }
 0x6be   : > { %2608 = vst.msk [vmem:[%s432_s16] sm:$0x1] %vm2607_vm11, %v2604_v36 }
 0x6bf   : > { %3660 = shalt.err (!%p3657_p3)
}
 0x6c0   : > { %s3661_s24 = scalar_lea.hbm %s4995_s23, 16  ;;  %s3665_s16 = scalar_lea.hbm %s5043_s13, 32 }
 0x6c1   : > { %p3662_p4 = scmp.ne.s32.totalorder %s4995_s23, %s3661_s24  ;;  %p3666_p9 = scmp.lt.s32.totalorder %s4995_s23, %s5043_s13 }
 0x6c2   : > { %p3667_p10 = scmp.lt.s32.totalorder %s3665_s16, %s3661_s24 }
 0x6c3   : > { %p3663_p7 = pnand %p3662_p4, %p3820_p5 }
 0x6c4   : > { %p3668_p11 = por %p3667_p10, %p3666_p9 }
 0x6c5   : > { %p3664_p8 = pneg %p3663_p7 }
 0x6c7   : > { %p3669_p12 = pnand %p3668_p11, %p3664_p8 }
 0x6c9   : > { %3672 = shalt.err (!%p3669_p12)
}
 0x6ca   : > { %3570 = dma.vmem_to_hbm [thread:$0]  (%p3820_p5), %s2623_s20, 16, %s4995_s23, %s2610_s30  }
 0x6cb PF: > { %p3576_p13 = scmp.ge.s32.totalorder %s3707_s28, 2  ;;  %s2634_s29 = sand.u32 1, %s3695_s25  }
 0x6cc   : > { %s2635_s17 = scalar_lea.sflag [#allocation3], %s2634_s29 }
 0x6cd   : > { %p3573_p0 = pnand %p3576_p13, %p3824_p6 }
 0x6cf   : > { %p3574_p1 = pneg %p3573_p0 }
 0x6d1   : > { %3690 = dma.done.wait (%p3574_p1), %s2635_s17, 16  }
 0x6d2   : > { %3692 = vsyncadd (%p3574_p1), %s2635_s17, 4294967280  ;;  %s5055_s28 = sld [smem:[#allocation6_spill]]  ;;  %s5058_s25 = smov %s3699_s26 }
 0x6d3   : > { %s5056_s14 = sld [smem:[#allocation5_spill]] }
 0x6d4   : > { %s5057_s27 = sld [smem:[#allocation7_spill]] }
 0x6d8   : > { %p23_p2 = scmp.ge.s32.totalorder %s5055_s28, 4  }
 0x6d9   : > { %s5059_s26 = smov %s5056_s14 }
 0x6da   :  { %25 = sbr.rel (!%p23_p2) target bundleno = 3 (0x3), region = 122 }
 0x6df   :  { %2639 = vsyncpa [#allocation3], 1 }
 0x6e0   :  { %2641 = vsyncpa [#allocation3 + $0x1], 1 }

</bundles_post_ra>
